<compile_context>
chip_gen: v7x
topology: tpu7x:2x2x1
jax: 0.10.0
libtpu: 0.0.40
codegen_flags: <defaults>
</compile_context>

<pallas_src>
import jax
import jax.numpy as jnp
from jax.experimental import pallas as pl
from jax.experimental.pallas import tpu as pltpu


def gru4rec_kernel(hist_ref, tgt_ref, seqlen_ref,
                   w_seq_ref, b_seq_ref,
                   w_t1_ref, b_t1_ref, w_t2_ref, b_t2_ref,
                   w_ih_ref, b_gate_ref, w_hh_ref, b_hhn_ref,
                   w_c1_ref, b_c1_ref, w_c2_ref, b_c2_ref,
                   out_ref, gi_scratch):
    T, TB, D = hist_ref.shape
    f32 = jnp.float32
    cdt = w_seq_ref.dtype            # MXU input dtype (f32 here, bf16 optional)

    # ---- target tower: Linear + tanh, Linear (StackedDense [tanh, None]) ----
    t1 = jnp.tanh(jnp.dot(tgt_ref[...], w_t1_ref[...],
                          preferred_element_type=f32) + b_t1_ref[...])
    target = jnp.dot(t1.astype(cdt), w_t2_ref[...],
                     preferred_element_type=f32) + b_t2_ref[...]

    # ---- hoisted: seq tower + input-to-hidden projection for all T steps ----
    # hist is time-major (T, TB, D); merge leading dims into one big GEMM with
    # M = T*TB so the MXU is not row-starved.
    hist2d = hist_ref[...].reshape(T * TB, D)
    x_all = jnp.tanh(jnp.dot(hist2d, w_seq_ref[...],
                             preferred_element_type=f32) + b_seq_ref[...])
    gi_all = jnp.dot(x_all.astype(cdt), w_ih_ref[...],
                     preferred_element_type=f32) + b_gate_ref[...]
    gi_scratch[...] = gi_all                                   # (T*TB, 3D) f32

    # hoist loop-invariant loads / broadcasts out of the recurrence
    w_hh = w_hh_ref[...]                                       # (D, 3D)
    b_hhn = b_hhn_ref[...]                                     # (1, D)
    seq_len = seqlen_ref[...]                                  # (TB, 1) int32

    def step(t, carry):
        h, user_state = carry
        row0 = pl.multiple_of(t * TB, TB)
        gi = gi_scratch[pl.ds(row0, TB), :]                    # (TB, 3D)
        gh = jnp.dot(h.astype(cdt), w_hh, preferred_element_type=f32)
        r = jax.nn.sigmoid(gi[:, 0:D] + gh[:, 0:D])
        z = jax.nn.sigmoid(gi[:, D:2 * D] + gh[:, D:2 * D])
        n = jnp.tanh(gi[:, 2 * D:] + r * (gh[:, 2 * D:] + b_hhn))
        h_new = (1.0 - z) * n + z * h
        # equivalent of user_state[range(B), seq_length, :]
        user_state = jnp.where(seq_len == t, h_new, user_state)
        return h_new, user_state

    init = (jnp.zeros((TB, D), f32), jnp.zeros((TB, D), f32))
    _, user_state = jax.lax.fori_loop(0, T, step, init, unroll=True)

    # ---- classifier: Linear + tanh, Linear (mlp_layers = 2) ----
    c1 = jnp.tanh(jnp.dot(user_state.astype(cdt), w_c1_ref[...],
                          preferred_element_type=f32) + b_c1_ref[...])
    user_emb = jnp.dot(c1.astype(cdt), w_c2_ref[...],
                       preferred_element_type=f32) + b_c2_ref[...]

    # final reduction: sum(user_emb * target, dim=1, keepdim=True) -> (TB, 1)
    out_ref[...] = jnp.sum(user_emb * target, axis=1, keepdims=True)


def gru4rec_forward(params, target_id, clk_seq, *, batch_tile=256,
                    mxu_dtype=jnp.float32):
    emb = params["embedding"]
    B, T = clk_seq.shape
    D = emb.shape[1]

    # ---- plain-JAX glue: embedding lookups, mask / seq_length ----
    target_embed = jnp.take(emb, target_id, axis=0).astype(mxu_dtype)   # (B, D)
    hist_embed = jnp.take(emb, clk_seq, axis=0)                          # (B, T, D)
    hist_tbd = jnp.transpose(hist_embed, (1, 0, 2)).astype(mxu_dtype)    # (T, B, D)
    mask = (clk_seq != 0).astype(jnp.int32)
    seq_len = jnp.maximum(jnp.sum(mask, axis=1) - 1, 0).astype(jnp.int32)
    seq_len = seq_len.reshape(B, 1)

    # Fold b_hh into the precomputed gi bias for the r/z gates; the n gate's
    # b_hh must stay separate because it is scaled by r inside the recurrence.
    b_gate = params["b_ih"] + jnp.concatenate(
        [params["b_hh"][:, :2 * D],
         jnp.zeros((1, D), params["b_hh"].dtype)], axis=1)               # (1, 3D)
    b_hh_n = params["b_hh"][:, 2 * D:]                                   # (1, D)

    # ---- batch tiling (sublane-aligned tile, pad batch if needed) ----
    # TODO(synk): on v7x (64 MiB VMEM) prefer batch_tile<=256 or mxu_dtype=bf16
    # when D/T grow; defaults here are sized well inside the 48 MiB limit.
    TB = min(batch_tile, B)
    if TB < B:
        TB = max(8, TB - (TB % 8))
    Bp = -(-B // TB) * TB
    if Bp != B:
        pad = Bp - B
        hist_tbd = jnp.pad(hist_tbd, ((0, 0), (0, pad), (0, 0)))
        target_embed = jnp.pad(target_embed, ((0, pad), (0, 0)))
        seq_len = jnp.pad(seq_len, ((0, pad), (0, 0)))

    wdt = mxu_dtype
    w_seq = params["w_seq"].astype(wdt)
    w_t1 = params["w_t1"].astype(wdt)
    w_t2 = params["w_t2"].astype(wdt)
    w_ih = params["w_ih"].astype(wdt)
    w_hh = params["w_hh"].astype(wdt)
    w_c1 = params["w_c1"].astype(wdt)
    w_c2 = params["w_c2"].astype(wdt)

    const2 = lambda i: (0, 0)

    in_specs = [
        pl.BlockSpec((T, TB, D), lambda i: (0, i, 0)),   # hist (time-major)
        pl.BlockSpec((TB, D), lambda i: (i, 0)),         # target embed
        pl.BlockSpec((TB, 1), lambda i: (i, 0)),         # seq_len
        pl.BlockSpec((D, D), const2), pl.BlockSpec((1, D), const2),          # seq tower
        pl.BlockSpec((D, D), const2), pl.BlockSpec((1, D), const2),          # target L1
        pl.BlockSpec((D, D), const2), pl.BlockSpec((1, D), const2),          # target L2
        pl.BlockSpec((D, 3 * D), const2), pl.BlockSpec((1, 3 * D), const2),  # W_ih / folded bias
        pl.BlockSpec((D, 3 * D), const2), pl.BlockSpec((1, D), const2),      # W_hh / b_hh(n)
        pl.BlockSpec((D, D), const2), pl.BlockSpec((1, D), const2),          # classifier L1
        pl.BlockSpec((D, D), const2), pl.BlockSpec((1, D), const2),          # classifier L2
    ]

    out = pl.pallas_call(
        gru4rec_kernel,
        grid=(Bp // TB,),
        in_specs=in_specs,
        out_specs=pl.BlockSpec((TB, 1), lambda i: (i, 0)),
        out_shape=jax.ShapeDtypeStruct((Bp, 1), jnp.float32),
        scratch_shapes=[pltpu.VMEM((T * TB, 3 * D), jnp.float32)],
        compiler_params=pltpu.CompilerParams(
            dimension_semantics=("parallel",),
            vmem_limit_bytes=48 * 1024 * 1024),
    )(hist_tbd, target_embed, seq_len,
      w_seq, params["b_seq"],
      w_t1, params["b_t1"], w_t2, params["b_t2"],
      w_ih, b_gate, w_hh, b_hh_n,
      w_c1, params["b_c1"], w_c2, params["b_c2"])

    return out[:B]


def make_params(key, vocab, d):
    ks = jax.random.split(key, 16)
    s = 0.1
    return {
        "embedding": jax.random.normal(ks[0], (vocab, d), jnp.float32) * s,
        "w_seq": jax.random.normal(ks[1], (d, d), jnp.float32) * s,
        "b_seq": jax.random.normal(ks[2], (1, d), jnp.float32) * s,
        "w_t1": jax.random.normal(ks[3], (d, d), jnp.float32) * s,
        "b_t1": jax.random.normal(ks[4], (1, d), jnp.float32) * s,
        "w_t2": jax.random.normal(ks[5], (d, d), jnp.float32) * s,
        "b_t2": jax.random.normal(ks[6], (1, d), jnp.float32) * s,
        "w_ih": jax.random.normal(ks[7], (d, 3 * d), jnp.float32) * s,
        "b_ih": jax.random.normal(ks[8], (1, 3 * d), jnp.float32) * s,
        "w_hh": jax.random.normal(ks[9], (d, 3 * d), jnp.float32) * s,
        "b_hh": jax.random.normal(ks[10], (1, 3 * d), jnp.float32) * s,
        "w_c1": jax.random.normal(ks[11], (d, d), jnp.float32) * s,
        "b_c1": jax.random.normal(ks[12], (1, d), jnp.float32) * s,
        "w_c2": jax.random.normal(ks[13], (d, d), jnp.float32) * s,
        "b_c2": jax.random.normal(ks[14], (1, d), jnp.float32) * s,
    }


def reference_forward(params, target_id, clk_seq):
    # pure-JAX reference mirroring the PyTorch module
    emb = params["embedding"]
    B, T = clk_seq.shape
    D = emb.shape[1]
    target = jnp.take(emb, target_id, axis=0)
    target = jnp.tanh(target @ params["w_t1"] + params["b_t1"])
    target = target @ params["w_t2"] + params["b_t2"]

    mask = (clk_seq != 0).astype(jnp.int32)
    seq_len = jnp.maximum(jnp.sum(mask, axis=1) - 1, 0)

    hist = jnp.take(emb, clk_seq, axis=0)
    hist = jnp.tanh(hist @ params["w_seq"] + params["b_seq"])

    h = jnp.zeros((B, D), jnp.float32)
    states = []
    for t in range(T):
        x_t = hist[:, t, :]
        gi = x_t @ params["w_ih"] + params["b_ih"]
        gh = h @ params["w_hh"] + params["b_hh"]
        r = jax.nn.sigmoid(gi[:, :D] + gh[:, :D])
        z = jax.nn.sigmoid(gi[:, D:2 * D] + gh[:, D:2 * D])
        n = jnp.tanh(gi[:, 2 * D:] + r * gh[:, 2 * D:])
        h = (1.0 - z) * n + z * h
        states.append(h)
    states = jnp.stack(states, axis=1)              # (B, T, D)
    user_state = states[jnp.arange(B), seq_len, :]  # gather last valid state

    c = jnp.tanh(user_state @ params["w_c1"] + params["b_c1"])
    user_emb = c @ params["w_c2"] + params["b_c2"]
    return jnp.sum(user_emb * target, axis=1, keepdims=True)


if __name__ == "__main__":
    B, T, D, VOCAB = 16, 8, 32, 50
    key = jax.random.PRNGKey(0)
    kp, kt, ks = jax.random.split(key, 3)

    params = make_params(kp, VOCAB, D)
    target_id = jax.random.randint(kt, (B,), 1, VOCAB, dtype=jnp.int32)
    clk_seq = jax.random.randint(ks, (B, T), 1, VOCAB, dtype=jnp.int32)
    # deterministic ragged zero-padding, like real click sequences
    lengths = (jnp.arange(B, dtype=jnp.int32) % T) + 1
    pad_mask = (jnp.arange(T, dtype=jnp.int32)[None, :] < lengths[:, None])
    clk_seq = clk_seq * pad_mask.astype(jnp.int32)

    fwd = jax.jit(lambda p, t, c: gru4rec_forward(p, t, c, batch_tile=8))
    out = jax.block_until_ready(fwd(params, target_id, clk_seq))

    ref = reference_forward(params, target_id, clk_seq)
    assert out.shape == (B, 1)
    assert jnp.allclose(out, ref, atol=1e-4, rtol=1e-4), (out, ref)

    print("KERNEL_OK")
</pallas_src>

<mosaic_0001>
module attributes {stable_mosaic.version = 11 : i64} {
  func.func @gru4rec_kernel(%arg0: i32, %arg1: memref<8x8x32xf32, #tpu.memory_space<vmem>>, %arg2: memref<8x32xf32, #tpu.memory_space<vmem>>, %arg3: memref<8x1xi32, #tpu.memory_space<vmem>>, %arg4: memref<32x32xf32, #tpu.memory_space<vmem>>, %arg5: memref<1x32xf32, #tpu.memory_space<vmem>>, %arg6: memref<32x32xf32, #tpu.memory_space<vmem>>, %arg7: memref<1x32xf32, #tpu.memory_space<vmem>>, %arg8: memref<32x32xf32, #tpu.memory_space<vmem>>, %arg9: memref<1x32xf32, #tpu.memory_space<vmem>>, %arg10: memref<32x96xf32, #tpu.memory_space<vmem>>, %arg11: memref<1x96xf32, #tpu.memory_space<vmem>>, %arg12: memref<32x96xf32, #tpu.memory_space<vmem>>, %arg13: memref<1x32xf32, #tpu.memory_space<vmem>>, %arg14: memref<32x32xf32, #tpu.memory_space<vmem>>, %arg15: memref<1x32xf32, #tpu.memory_space<vmem>>, %arg16: memref<32x32xf32, #tpu.memory_space<vmem>>, %arg17: memref<1x32xf32, #tpu.memory_space<vmem>>, %arg18: memref<8x1xf32, #tpu.memory_space<vmem>>, %arg19: memref<64x96xf32, #tpu.memory_space<vmem>>) attributes {dimension_semantics = [#tpu.dimension_semantics<parallel>], iteration_bounds = array<i64: 2>, scalar_prefetch = 0 : i64, scratch_operands = 1 : i64, tpu.core_type = #tpu.core_type<tc>, window_params = [{transform_indices = @transform_0, window_bounds = array<i64: 8, 8, 32>}, {transform_indices = @transform_1, window_bounds = array<i64: 8, 32>}, {transform_indices = @transform_2, window_bounds = array<i64: 8, 1>}, {pipeline_mode = #tpu.pipeline_mode<synchronous>, transform_indices = @transform_3, window_bounds = array<i64: 32, 32>}, {pipeline_mode = #tpu.pipeline_mode<synchronous>, transform_indices = @transform_4, window_bounds = array<i64: 1, 32>}, {pipeline_mode = #tpu.pipeline_mode<synchronous>, transform_indices = @transform_5, window_bounds = array<i64: 32, 32>}, {pipeline_mode = #tpu.pipeline_mode<synchronous>, transform_indices = @transform_6, window_bounds = array<i64: 1, 32>}, {pipeline_mode = #tpu.pipeline_mode<synchronous>, transform_indices = @transform_7, window_bounds = array<i64: 32, 32>}, {pipeline_mode = #tpu.pipeline_mode<synchronous>, transform_indices = @transform_8, window_bounds = array<i64: 1, 32>}, {pipeline_mode = #tpu.pipeline_mode<synchronous>, transform_indices = @transform_9, window_bounds = array<i64: 32, 96>}, {pipeline_mode = #tpu.pipeline_mode<synchronous>, transform_indices = @transform_10, window_bounds = array<i64: 1, 96>}, {pipeline_mode = #tpu.pipeline_mode<synchronous>, transform_indices = @transform_11, window_bounds = array<i64: 32, 96>}, {pipeline_mode = #tpu.pipeline_mode<synchronous>, transform_indices = @transform_12, window_bounds = array<i64: 1, 32>}, {pipeline_mode = #tpu.pipeline_mode<synchronous>, transform_indices = @transform_13, window_bounds = array<i64: 32, 32>}, {pipeline_mode = #tpu.pipeline_mode<synchronous>, transform_indices = @transform_14, window_bounds = array<i64: 1, 32>}, {pipeline_mode = #tpu.pipeline_mode<synchronous>, transform_indices = @transform_15, window_bounds = array<i64: 32, 32>}, {pipeline_mode = #tpu.pipeline_mode<synchronous>, transform_indices = @transform_16, window_bounds = array<i64: 1, 32>}, {transform_indices = @transform_17, window_bounds = array<i64: 8, 1>}]} {
    %c0 = arith.constant 0 : index
    %c0_0 = arith.constant 0 : index
    %0 = vector.load %arg2[%c0, %c0_0] : memref<8x32xf32, #tpu.memory_space<vmem>>, vector<8x32xf32>
    %c0_1 = arith.constant 0 : index
    %c0_2 = arith.constant 0 : index
    %1 = vector.load %arg6[%c0_1, %c0_2] : memref<32x32xf32, #tpu.memory_space<vmem>>, vector<32x32xf32>
    %cst = arith.constant dense<0.000000e+00> : vector<8x32xf32>
    %2 = tpu.matmul %0, %1, %cst {dimension_numbers = #tpu.dot_dimension_numbers<[1], [0], [0], [1], [0, 0, 1, 1], [], []>} : vector<8x32xf32>, vector<32x32xf32>, vector<8x32xf32> -> vector<8x32xf32>
    %c0_3 = arith.constant 0 : index
    %c0_4 = arith.constant 0 : index
    %3 = vector.load %arg7[%c0_3, %c0_4] : memref<1x32xf32, #tpu.memory_space<vmem>>, vector<1x32xf32>
    %4 = vector.broadcast %3 : vector<1x32xf32> to vector<8x32xf32>
    %5 = arith.addf %2, %4 : vector<8x32xf32>
    %6 = math.tanh %5 : vector<8x32xf32>
    %c0_5 = arith.constant 0 : index
    %c0_6 = arith.constant 0 : index
    %7 = vector.load %arg8[%c0_5, %c0_6] : memref<32x32xf32, #tpu.memory_space<vmem>>, vector<32x32xf32>
    %cst_7 = arith.constant dense<0.000000e+00> : vector<8x32xf32>
    %8 = tpu.matmul %6, %7, %cst_7 {dimension_numbers = #tpu.dot_dimension_numbers<[1], [0], [0], [1], [0, 0, 1, 1], [], []>} : vector<8x32xf32>, vector<32x32xf32>, vector<8x32xf32> -> vector<8x32xf32>
    %c0_8 = arith.constant 0 : index
    %c0_9 = arith.constant 0 : index
    %9 = vector.load %arg9[%c0_8, %c0_9] : memref<1x32xf32, #tpu.memory_space<vmem>>, vector<1x32xf32>
    %10 = vector.broadcast %9 : vector<1x32xf32> to vector<8x32xf32>
    %11 = arith.addf %8, %10 : vector<8x32xf32>
    %c0_10 = arith.constant 0 : index
    %c0_11 = arith.constant 0 : index
    %c0_12 = arith.constant 0 : index
    %12 = vector.load %arg1[%c0_10, %c0_11, %c0_12] : memref<8x8x32xf32, #tpu.memory_space<vmem>>, vector<8x8x32xf32>
    %13 = vector.shape_cast %12 : vector<8x8x32xf32> to vector<64x32xf32>
    %c0_13 = arith.constant 0 : index
    %c0_14 = arith.constant 0 : index
    %14 = vector.load %arg4[%c0_13, %c0_14] : memref<32x32xf32, #tpu.memory_space<vmem>>, vector<32x32xf32>
    %cst_15 = arith.constant dense<0.000000e+00> : vector<64x32xf32>
    %15 = tpu.matmul %13, %14, %cst_15 {dimension_numbers = #tpu.dot_dimension_numbers<[1], [0], [0], [1], [0, 0, 1, 1], [], []>} : vector<64x32xf32>, vector<32x32xf32>, vector<64x32xf32> -> vector<64x32xf32>
    %c0_16 = arith.constant 0 : index
    %c0_17 = arith.constant 0 : index
    %16 = vector.load %arg5[%c0_16, %c0_17] : memref<1x32xf32, #tpu.memory_space<vmem>>, vector<1x32xf32>
    %17 = vector.broadcast %16 : vector<1x32xf32> to vector<64x32xf32>
    %18 = arith.addf %15, %17 : vector<64x32xf32>
    %19 = math.tanh %18 : vector<64x32xf32>
    %c0_18 = arith.constant 0 : index
    %c0_19 = arith.constant 0 : index
    %20 = vector.load %arg10[%c0_18, %c0_19] : memref<32x96xf32, #tpu.memory_space<vmem>>, vector<32x96xf32>
    %cst_20 = arith.constant dense<0.000000e+00> : vector<64x96xf32>
    %21 = tpu.matmul %19, %20, %cst_20 {dimension_numbers = #tpu.dot_dimension_numbers<[1], [0], [0], [1], [0, 0, 1, 1], [], []>} : vector<64x32xf32>, vector<32x96xf32>, vector<64x96xf32> -> vector<64x96xf32>
    %c0_21 = arith.constant 0 : index
    %c0_22 = arith.constant 0 : index
    %22 = vector.load %arg11[%c0_21, %c0_22] : memref<1x96xf32, #tpu.memory_space<vmem>>, vector<1x96xf32>
    %23 = vector.broadcast %22 : vector<1x96xf32> to vector<64x96xf32>
    %24 = arith.addf %21, %23 : vector<64x96xf32>
    %c0_23 = arith.constant 0 : index
    %c0_24 = arith.constant 0 : index
    %25 = vector.load %arg19[%c0_23, %c0_24] : memref<64x96xf32, #tpu.memory_space<vmem>>, vector<64x96xf32>
    tpu.vector_store %arg19[%c0_23, %c0_24], %24 {strides = array<i32>} : memref<64x96xf32, #tpu.memory_space<vmem>>, vector<64x96xf32>,
    %c0_25 = arith.constant 0 : index
    %c0_26 = arith.constant 0 : index
    %26 = vector.load %arg12[%c0_25, %c0_26] : memref<32x96xf32, #tpu.memory_space<vmem>>, vector<32x96xf32>
    %c0_27 = arith.constant 0 : index
    %c0_28 = arith.constant 0 : index
    %27 = vector.load %arg13[%c0_27, %c0_28] : memref<1x32xf32, #tpu.memory_space<vmem>>, vector<1x32xf32>
    %c0_29 = arith.constant 0 : index
    %c0_30 = arith.constant 0 : index
    %28 = vector.load %arg3[%c0_29, %c0_30] : memref<8x1xi32, #tpu.memory_space<vmem>>, vector<8x1xi32>
    %cst_31 = arith.constant 0.000000e+00 : f32
    %29 = vector.broadcast %cst_31 : f32 to vector<8x32xf32>
    %cst_32 = arith.constant 0.000000e+00 : f32
    %30 = vector.broadcast %cst_32 : f32 to vector<8x32xf32>
    %c0_i32 = arith.constant 0 : i32
    %c8_i32 = arith.constant 8 : i32
    %31 = arith.muli %c0_i32, %c8_i32 : i32
    %32 = tpu.assume_multiple %31, 8 : i32
    %33 = arith.index_cast %32 : i32 to index
    %c0_33 = arith.constant 0 : index
    %34 = vector.load %arg19[%33, %c0_33] : memref<64x96xf32, #tpu.memory_space<vmem>>, vector<8x96xf32>
    %cst_34 = arith.constant dense<0.000000e+00> : vector<8x96xf32>
    %35 = tpu.matmul %29, %26, %cst_34 {dimension_numbers = #tpu.dot_dimension_numbers<[1], [0], [0], [1], [0, 0, 1, 1], [], []>} : vector<8x32xf32>, vector<32x96xf32>, vector<8x96xf32> -> vector<8x96xf32>
    %36 = vector.extract_strided_slice %34 {offsets = [0, 0], sizes = [8, 32], strides = [1, 1]} : vector<8x96xf32> to vector<8x32xf32>
    %37 = vector.extract_strided_slice %35 {offsets = [0, 0], sizes = [8, 32], strides = [1, 1]} : vector<8x96xf32> to vector<8x32xf32>
    %38 = arith.addf %36, %37 : vector<8x32xf32>
    %39 = arith.negf %38 : vector<8x32xf32>
    %40 = math.exp %39 : vector<8x32xf32>
    %cst_35 = arith.constant 1.000000e+00 : f32
    %41 = vector.broadcast %cst_35 : f32 to vector<8x32xf32>
    %42 = arith.addf %41, %40 : vector<8x32xf32>
    %43 = arith.divf %41, %42 : vector<8x32xf32>
    %44 = vector.extract_strided_slice %34 {offsets = [0, 32], sizes = [8, 32], strides = [1, 1]} : vector<8x96xf32> to vector<8x32xf32>
    %45 = vector.extract_strided_slice %35 {offsets = [0, 32], sizes = [8, 32], strides = [1, 1]} : vector<8x96xf32> to vector<8x32xf32>
    %46 = arith.addf %44, %45 : vector<8x32xf32>
    %47 = arith.negf %46 : vector<8x32xf32>
    %48 = math.exp %47 : vector<8x32xf32>
    %cst_36 = arith.constant 1.000000e+00 : f32
    %49 = vector.broadcast %cst_36 : f32 to vector<8x32xf32>
    %50 = arith.addf %49, %48 : vector<8x32xf32>
    %51 = arith.divf %49, %50 : vector<8x32xf32>
    %52 = vector.extract_strided_slice %34 {offsets = [0, 64], sizes = [8, 32], strides = [1, 1]} : vector<8x96xf32> to vector<8x32xf32>
    %53 = vector.extract_strided_slice %35 {offsets = [0, 64], sizes = [8, 32], strides = [1, 1]} : vector<8x96xf32> to vector<8x32xf32>
    %54 = vector.broadcast %27 : vector<1x32xf32> to vector<8x32xf32>
    %55 = arith.addf %53, %54 : vector<8x32xf32>
    %56 = arith.mulf %43, %55 : vector<8x32xf32>
    %57 = arith.addf %52, %56 : vector<8x32xf32>
    %58 = math.tanh %57 : vector<8x32xf32>
    %cst_37 = arith.constant 1.000000e+00 : f32
    %59 = vector.broadcast %cst_37 : f32 to vector<8x32xf32>
    %60 = arith.subf %59, %51 : vector<8x32xf32>
    %61 = arith.mulf %60, %58 : vector<8x32xf32>
    %62 = arith.mulf %51, %29 : vector<8x32xf32>
    %63 = arith.addf %61, %62 : vector<8x32xf32>
    %64 = vector.broadcast %c0_i32 : i32 to vector<8x1xi32>
    %65 = arith.cmpi eq, %28, %64 : vector<8x1xi32>
    %66 = vector.shape_cast %65 : vector<8x1xi1> to vector<8x1xi1>
    %67 = vector.broadcast %66 : vector<8x1xi1> to vector<8x32xi1>
    %68 = arith.select %67, %63, %30 : vector<8x32xi1>, vector<8x32xf32>
    %c1_i32 = arith.constant 1 : i32
    %c8_i32_38 = arith.constant 8 : i32
    %69 = arith.muli %c1_i32, %c8_i32_38 : i32
    %70 = tpu.assume_multiple %69, 8 : i32
    %71 = arith.index_cast %70 : i32 to index
    %c0_39 = arith.constant 0 : index
    %72 = vector.load %arg19[%71, %c0_39] : memref<64x96xf32, #tpu.memory_space<vmem>>, vector<8x96xf32>
    %cst_40 = arith.constant dense<0.000000e+00> : vector<8x96xf32>
    %73 = tpu.matmul %63, %26, %cst_40 {dimension_numbers = #tpu.dot_dimension_numbers<[1], [0], [0], [1], [0, 0, 1, 1], [], []>} : vector<8x32xf32>, vector<32x96xf32>, vector<8x96xf32> -> vector<8x96xf32>
    %74 = vector.extract_strided_slice %72 {offsets = [0, 0], sizes = [8, 32], strides = [1, 1]} : vector<8x96xf32> to vector<8x32xf32>
    %75 = vector.extract_strided_slice %73 {offsets = [0, 0], sizes = [8, 32], strides = [1, 1]} : vector<8x96xf32> to vector<8x32xf32>
    %76 = arith.addf %74, %75 : vector<8x32xf32>
    %77 = arith.negf %76 : vector<8x32xf32>
    %78 = math.exp %77 : vector<8x32xf32>
    %cst_41 = arith.constant 1.000000e+00 : f32
    %79 = vector.broadcast %cst_41 : f32 to vector<8x32xf32>
    %80 = arith.addf %79, %78 : vector<8x32xf32>
    %81 = arith.divf %79, %80 : vector<8x32xf32>
    %82 = vector.extract_strided_slice %72 {offsets = [0, 32], sizes = [8, 32], strides = [1, 1]} : vector<8x96xf32> to vector<8x32xf32>
    %83 = vector.extract_strided_slice %73 {offsets = [0, 32], sizes = [8, 32], strides = [1, 1]} : vector<8x96xf32> to vector<8x32xf32>
    %84 = arith.addf %82, %83 : vector<8x32xf32>
    %85 = arith.negf %84 : vector<8x32xf32>
    %86 = math.exp %85 : vector<8x32xf32>
    %cst_42 = arith.constant 1.000000e+00 : f32
    %87 = vector.broadcast %cst_42 : f32 to vector<8x32xf32>
    %88 = arith.addf %87, %86 : vector<8x32xf32>
    %89 = arith.divf %87, %88 : vector<8x32xf32>
    %90 = vector.extract_strided_slice %72 {offsets = [0, 64], sizes = [8, 32], strides = [1, 1]} : vector<8x96xf32> to vector<8x32xf32>
    %91 = vector.extract_strided_slice %73 {offsets = [0, 64], sizes = [8, 32], strides = [1, 1]} : vector<8x96xf32> to vector<8x32xf32>
    %92 = vector.broadcast %27 : vector<1x32xf32> to vector<8x32xf32>
    %93 = arith.addf %91, %92 : vector<8x32xf32>
    %94 = arith.mulf %81, %93 : vector<8x32xf32>
    %95 = arith.addf %90, %94 : vector<8x32xf32>
    %96 = math.tanh %95 : vector<8x32xf32>
    %cst_43 = arith.constant 1.000000e+00 : f32
    %97 = vector.broadcast %cst_43 : f32 to vector<8x32xf32>
    %98 = arith.subf %97, %89 : vector<8x32xf32>
    %99 = arith.mulf %98, %96 : vector<8x32xf32>
    %100 = arith.mulf %89, %63 : vector<8x32xf32>
    %101 = arith.addf %99, %100 : vector<8x32xf32>
    %102 = vector.broadcast %c1_i32 : i32 to vector<8x1xi32>
    %103 = arith.cmpi eq, %28, %102 : vector<8x1xi32>
    %104 = vector.shape_cast %103 : vector<8x1xi1> to vector<8x1xi1>
    %105 = vector.broadcast %104 : vector<8x1xi1> to vector<8x32xi1>
    %106 = arith.select %105, %101, %68 : vector<8x32xi1>, vector<8x32xf32>
    %c2_i32 = arith.constant 2 : i32
    %c8_i32_44 = arith.constant 8 : i32
    %107 = arith.muli %c2_i32, %c8_i32_44 : i32
    %108 = tpu.assume_multiple %107, 8 : i32
    %109 = arith.index_cast %108 : i32 to index
    %c0_45 = arith.constant 0 : index
    %110 = vector.load %arg19[%109, %c0_45] : memref<64x96xf32, #tpu.memory_space<vmem>>, vector<8x96xf32>
    %cst_46 = arith.constant dense<0.000000e+00> : vector<8x96xf32>
    %111 = tpu.matmul %101, %26, %cst_46 {dimension_numbers = #tpu.dot_dimension_numbers<[1], [0], [0], [1], [0, 0, 1, 1], [], []>} : vector<8x32xf32>, vector<32x96xf32>, vector<8x96xf32> -> vector<8x96xf32>
    %112 = vector.extract_strided_slice %110 {offsets = [0, 0], sizes = [8, 32], strides = [1, 1]} : vector<8x96xf32> to vector<8x32xf32>
    %113 = vector.extract_strided_slice %111 {offsets = [0, 0], sizes = [8, 32], strides = [1, 1]} : vector<8x96xf32> to vector<8x32xf32>
    %114 = arith.addf %112, %113 : vector<8x32xf32>
    %115 = arith.negf %114 : vector<8x32xf32>
    %116 = math.exp %115 : vector<8x32xf32>
    %cst_47 = arith.constant 1.000000e+00 : f32
    %117 = vector.broadcast %cst_47 : f32 to vector<8x32xf32>
    %118 = arith.addf %117, %116 : vector<8x32xf32>
    %119 = arith.divf %117, %118 : vector<8x32xf32>
    %120 = vector.extract_strided_slice %110 {offsets = [0, 32], sizes = [8, 32], strides = [1, 1]} : vector<8x96xf32> to vector<8x32xf32>
    %121 = vector.extract_strided_slice %111 {offsets = [0, 32], sizes = [8, 32], strides = [1, 1]} : vector<8x96xf32> to vector<8x32xf32>
    %122 = arith.addf %120, %121 : vector<8x32xf32>
    %123 = arith.negf %122 : vector<8x32xf32>
    %124 = math.exp %123 : vector<8x32xf32>
    %cst_48 = arith.constant 1.000000e+00 : f32
    %125 = vector.broadcast %cst_48 : f32 to vector<8x32xf32>
    %126 = arith.addf %125, %124 : vector<8x32xf32>
    %127 = arith.divf %125, %126 : vector<8x32xf32>
    %128 = vector.extract_strided_slice %110 {offsets = [0, 64], sizes = [8, 32], strides = [1, 1]} : vector<8x96xf32> to vector<8x32xf32>
    %129 = vector.extract_strided_slice %111 {offsets = [0, 64], sizes = [8, 32], strides = [1, 1]} : vector<8x96xf32> to vector<8x32xf32>
    %130 = vector.broadcast %27 : vector<1x32xf32> to vector<8x32xf32>
    %131 = arith.addf %129, %130 : vector<8x32xf32>
    %132 = arith.mulf %119, %131 : vector<8x32xf32>
    %133 = arith.addf %128, %132 : vector<8x32xf32>
    %134 = math.tanh %133 : vector<8x32xf32>
    %cst_49 = arith.constant 1.000000e+00 : f32
    %135 = vector.broadcast %cst_49 : f32 to vector<8x32xf32>
    %136 = arith.subf %135, %127 : vector<8x32xf32>
    %137 = arith.mulf %136, %134 : vector<8x32xf32>
    %138 = arith.mulf %127, %101 : vector<8x32xf32>
    %139 = arith.addf %137, %138 : vector<8x32xf32>
    %140 = vector.broadcast %c2_i32 : i32 to vector<8x1xi32>
    %141 = arith.cmpi eq, %28, %140 : vector<8x1xi32>
    %142 = vector.shape_cast %141 : vector<8x1xi1> to vector<8x1xi1>
    %143 = vector.broadcast %142 : vector<8x1xi1> to vector<8x32xi1>
    %144 = arith.select %143, %139, %106 : vector<8x32xi1>, vector<8x32xf32>
    %c3_i32 = arith.constant 3 : i32
    %c8_i32_50 = arith.constant 8 : i32
    %145 = arith.muli %c3_i32, %c8_i32_50 : i32
    %146 = tpu.assume_multiple %145, 8 : i32
    %147 = arith.index_cast %146 : i32 to index
    %c0_51 = arith.constant 0 : index
    %148 = vector.load %arg19[%147, %c0_51] : memref<64x96xf32, #tpu.memory_space<vmem>>, vector<8x96xf32>
    %cst_52 = arith.constant dense<0.000000e+00> : vector<8x96xf32>
    %149 = tpu.matmul %139, %26, %cst_52 {dimension_numbers = #tpu.dot_dimension_numbers<[1], [0], [0], [1], [0, 0, 1, 1], [], []>} : vector<8x32xf32>, vector<32x96xf32>, vector<8x96xf32> -> vector<8x96xf32>
    %150 = vector.extract_strided_slice %148 {offsets = [0, 0], sizes = [8, 32], strides = [1, 1]} : vector<8x96xf32> to vector<8x32xf32>
    %151 = vector.extract_strided_slice %149 {offsets = [0, 0], sizes = [8, 32], strides = [1, 1]} : vector<8x96xf32> to vector<8x32xf32>
    %152 = arith.addf %150, %151 : vector<8x32xf32>
    %153 = arith.negf %152 : vector<8x32xf32>
    %154 = math.exp %153 : vector<8x32xf32>
    %cst_53 = arith.constant 1.000000e+00 : f32
    %155 = vector.broadcast %cst_53 : f32 to vector<8x32xf32>
    %156 = arith.addf %155, %154 : vector<8x32xf32>
    %157 = arith.divf %155, %156 : vector<8x32xf32>
    %158 = vector.extract_strided_slice %148 {offsets = [0, 32], sizes = [8, 32], strides = [1, 1]} : vector<8x96xf32> to vector<8x32xf32>
    %159 = vector.extract_strided_slice %149 {offsets = [0, 32], sizes = [8, 32], strides = [1, 1]} : vector<8x96xf32> to vector<8x32xf32>
    %160 = arith.addf %158, %159 : vector<8x32xf32>
    %161 = arith.negf %160 : vector<8x32xf32>
    %162 = math.exp %161 : vector<8x32xf32>
    %cst_54 = arith.constant 1.000000e+00 : f32
    %163 = vector.broadcast %cst_54 : f32 to vector<8x32xf32>
    %164 = arith.addf %163, %162 : vector<8x32xf32>
    %165 = arith.divf %163, %164 : vector<8x32xf32>
    %166 = vector.extract_strided_slice %148 {offsets = [0, 64], sizes = [8, 32], strides = [1, 1]} : vector<8x96xf32> to vector<8x32xf32>
    %167 = vector.extract_strided_slice %149 {offsets = [0, 64], sizes = [8, 32], strides = [1, 1]} : vector<8x96xf32> to vector<8x32xf32>
    %168 = vector.broadcast %27 : vector<1x32xf32> to vector<8x32xf32>
    %169 = arith.addf %167, %168 : vector<8x32xf32>
    %170 = arith.mulf %157, %169 : vector<8x32xf32>
    %171 = arith.addf %166, %170 : vector<8x32xf32>
    %172 = math.tanh %171 : vector<8x32xf32>
    %cst_55 = arith.constant 1.000000e+00 : f32
    %173 = vector.broadcast %cst_55 : f32 to vector<8x32xf32>
    %174 = arith.subf %173, %165 : vector<8x32xf32>
    %175 = arith.mulf %174, %172 : vector<8x32xf32>
    %176 = arith.mulf %165, %139 : vector<8x32xf32>
    %177 = arith.addf %175, %176 : vector<8x32xf32>
    %178 = vector.broadcast %c3_i32 : i32 to vector<8x1xi32>
    %179 = arith.cmpi eq, %28, %178 : vector<8x1xi32>
    %180 = vector.shape_cast %179 : vector<8x1xi1> to vector<8x1xi1>
    %181 = vector.broadcast %180 : vector<8x1xi1> to vector<8x32xi1>
    %182 = arith.select %181, %177, %144 : vector<8x32xi1>, vector<8x32xf32>
    %c4_i32 = arith.constant 4 : i32
    %c8_i32_56 = arith.constant 8 : i32
    %183 = arith.muli %c4_i32, %c8_i32_56 : i32
    %184 = tpu.assume_multiple %183, 8 : i32
    %185 = arith.index_cast %184 : i32 to index
    %c0_57 = arith.constant 0 : index
    %186 = vector.load %arg19[%185, %c0_57] : memref<64x96xf32, #tpu.memory_space<vmem>>, vector<8x96xf32>
    %cst_58 = arith.constant dense<0.000000e+00> : vector<8x96xf32>
    %187 = tpu.matmul %177, %26, %cst_58 {dimension_numbers = #tpu.dot_dimension_numbers<[1], [0], [0], [1], [0, 0, 1, 1], [], []>} : vector<8x32xf32>, vector<32x96xf32>, vector<8x96xf32> -> vector<8x96xf32>
    %188 = vector.extract_strided_slice %186 {offsets = [0, 0], sizes = [8, 32], strides = [1, 1]} : vector<8x96xf32> to vector<8x32xf32>
    %189 = vector.extract_strided_slice %187 {offsets = [0, 0], sizes = [8, 32], strides = [1, 1]} : vector<8x96xf32> to vector<8x32xf32>
    %190 = arith.addf %188, %189 : vector<8x32xf32>
    %191 = arith.negf %190 : vector<8x32xf32>
    %192 = math.exp %191 : vector<8x32xf32>
    %cst_59 = arith.constant 1.000000e+00 : f32
    %193 = vector.broadcast %cst_59 : f32 to vector<8x32xf32>
    %194 = arith.addf %193, %192 : vector<8x32xf32>
    %195 = arith.divf %193, %194 : vector<8x32xf32>
    %196 = vector.extract_strided_slice %186 {offsets = [0, 32], sizes = [8, 32], strides = [1, 1]} : vector<8x96xf32> to vector<8x32xf32>
    %197 = vector.extract_strided_slice %187 {offsets = [0, 32], sizes = [8, 32], strides = [1, 1]} : vector<8x96xf32> to vector<8x32xf32>
    %198 = arith.addf %196, %197 : vector<8x32xf32>
    %199 = arith.negf %198 : vector<8x32xf32>
    %200 = math.exp %199 : vector<8x32xf32>
    %cst_60 = arith.constant 1.000000e+00 : f32
    %201 = vector.broadcast %cst_60 : f32 to vector<8x32xf32>
    %202 = arith.addf %201, %200 : vector<8x32xf32>
    %203 = arith.divf %201, %202 : vector<8x32xf32>
    %204 = vector.extract_strided_slice %186 {offsets = [0, 64], sizes = [8, 32], strides = [1, 1]} : vector<8x96xf32> to vector<8x32xf32>
    %205 = vector.extract_strided_slice %187 {offsets = [0, 64], sizes = [8, 32], strides = [1, 1]} : vector<8x96xf32> to vector<8x32xf32>
    %206 = vector.broadcast %27 : vector<1x32xf32> to vector<8x32xf32>
    %207 = arith.addf %205, %206 : vector<8x32xf32>
    %208 = arith.mulf %195, %207 : vector<8x32xf32>
    %209 = arith.addf %204, %208 : vector<8x32xf32>
    %210 = math.tanh %209 : vector<8x32xf32>
    %cst_61 = arith.constant 1.000000e+00 : f32
    %211 = vector.broadcast %cst_61 : f32 to vector<8x32xf32>
    %212 = arith.subf %211, %203 : vector<8x32xf32>
    %213 = arith.mulf %212, %210 : vector<8x32xf32>
    %214 = arith.mulf %203, %177 : vector<8x32xf32>
    %215 = arith.addf %213, %214 : vector<8x32xf32>
    %216 = vector.broadcast %c4_i32 : i32 to vector<8x1xi32>
    %217 = arith.cmpi eq, %28, %216 : vector<8x1xi32>
    %218 = vector.shape_cast %217 : vector<8x1xi1> to vector<8x1xi1>
    %219 = vector.broadcast %218 : vector<8x1xi1> to vector<8x32xi1>
    %220 = arith.select %219, %215, %182 : vector<8x32xi1>, vector<8x32xf32>
    %c5_i32 = arith.constant 5 : i32
    %c8_i32_62 = arith.constant 8 : i32
    %221 = arith.muli %c5_i32, %c8_i32_62 : i32
    %222 = tpu.assume_multiple %221, 8 : i32
    %223 = arith.index_cast %222 : i32 to index
    %c0_63 = arith.constant 0 : index
    %224 = vector.load %arg19[%223, %c0_63] : memref<64x96xf32, #tpu.memory_space<vmem>>, vector<8x96xf32>
    %cst_64 = arith.constant dense<0.000000e+00> : vector<8x96xf32>
    %225 = tpu.matmul %215, %26, %cst_64 {dimension_numbers = #tpu.dot_dimension_numbers<[1], [0], [0], [1], [0, 0, 1, 1], [], []>} : vector<8x32xf32>, vector<32x96xf32>, vector<8x96xf32> -> vector<8x96xf32>
    %226 = vector.extract_strided_slice %224 {offsets = [0, 0], sizes = [8, 32], strides = [1, 1]} : vector<8x96xf32> to vector<8x32xf32>
    %227 = vector.extract_strided_slice %225 {offsets = [0, 0], sizes = [8, 32], strides = [1, 1]} : vector<8x96xf32> to vector<8x32xf32>
    %228 = arith.addf %226, %227 : vector<8x32xf32>
    %229 = arith.negf %228 : vector<8x32xf32>
    %230 = math.exp %229 : vector<8x32xf32>
    %cst_65 = arith.constant 1.000000e+00 : f32
    %231 = vector.broadcast %cst_65 : f32 to vector<8x32xf32>
    %232 = arith.addf %231, %230 : vector<8x32xf32>
    %233 = arith.divf %231, %232 : vector<8x32xf32>
    %234 = vector.extract_strided_slice %224 {offsets = [0, 32], sizes = [8, 32], strides = [1, 1]} : vector<8x96xf32> to vector<8x32xf32>
    %235 = vector.extract_strided_slice %225 {offsets = [0, 32], sizes = [8, 32], strides = [1, 1]} : vector<8x96xf32> to vector<8x32xf32>
    %236 = arith.addf %234, %235 : vector<8x32xf32>
    %237 = arith.negf %236 : vector<8x32xf32>
    %238 = math.exp %237 : vector<8x32xf32>
    %cst_66 = arith.constant 1.000000e+00 : f32
    %239 = vector.broadcast %cst_66 : f32 to vector<8x32xf32>
    %240 = arith.addf %239, %238 : vector<8x32xf32>
    %241 = arith.divf %239, %240 : vector<8x32xf32>
    %242 = vector.extract_strided_slice %224 {offsets = [0, 64], sizes = [8, 32], strides = [1, 1]} : vector<8x96xf32> to vector<8x32xf32>
    %243 = vector.extract_strided_slice %225 {offsets = [0, 64], sizes = [8, 32], strides = [1, 1]} : vector<8x96xf32> to vector<8x32xf32>
    %244 = vector.broadcast %27 : vector<1x32xf32> to vector<8x32xf32>
    %245 = arith.addf %243, %244 : vector<8x32xf32>
    %246 = arith.mulf %233, %245 : vector<8x32xf32>
    %247 = arith.addf %242, %246 : vector<8x32xf32>
    %248 = math.tanh %247 : vector<8x32xf32>
    %cst_67 = arith.constant 1.000000e+00 : f32
    %249 = vector.broadcast %cst_67 : f32 to vector<8x32xf32>
    %250 = arith.subf %249, %241 : vector<8x32xf32>
    %251 = arith.mulf %250, %248 : vector<8x32xf32>
    %252 = arith.mulf %241, %215 : vector<8x32xf32>
    %253 = arith.addf %251, %252 : vector<8x32xf32>
    %254 = vector.broadcast %c5_i32 : i32 to vector<8x1xi32>
    %255 = arith.cmpi eq, %28, %254 : vector<8x1xi32>
    %256 = vector.shape_cast %255 : vector<8x1xi1> to vector<8x1xi1>
    %257 = vector.broadcast %256 : vector<8x1xi1> to vector<8x32xi1>
    %258 = arith.select %257, %253, %220 : vector<8x32xi1>, vector<8x32xf32>
    %c6_i32 = arith.constant 6 : i32
    %c8_i32_68 = arith.constant 8 : i32
    %259 = arith.muli %c6_i32, %c8_i32_68 : i32
    %260 = tpu.assume_multiple %259, 8 : i32
    %261 = arith.index_cast %260 : i32 to index
    %c0_69 = arith.constant 0 : index
    %262 = vector.load %arg19[%261, %c0_69] : memref<64x96xf32, #tpu.memory_space<vmem>>, vector<8x96xf32>
    %cst_70 = arith.constant dense<0.000000e+00> : vector<8x96xf32>
    %263 = tpu.matmul %253, %26, %cst_70 {dimension_numbers = #tpu.dot_dimension_numbers<[1], [0], [0], [1], [0, 0, 1, 1], [], []>} : vector<8x32xf32>, vector<32x96xf32>, vector<8x96xf32> -> vector<8x96xf32>
    %264 = vector.extract_strided_slice %262 {offsets = [0, 0], sizes = [8, 32], strides = [1, 1]} : vector<8x96xf32> to vector<8x32xf32>
    %265 = vector.extract_strided_slice %263 {offsets = [0, 0], sizes = [8, 32], strides = [1, 1]} : vector<8x96xf32> to vector<8x32xf32>
    %266 = arith.addf %264, %265 : vector<8x32xf32>
    %267 = arith.negf %266 : vector<8x32xf32>
    %268 = math.exp %267 : vector<8x32xf32>
    %cst_71 = arith.constant 1.000000e+00 : f32
    %269 = vector.broadcast %cst_71 : f32 to vector<8x32xf32>
    %270 = arith.addf %269, %268 : vector<8x32xf32>
    %271 = arith.divf %269, %270 : vector<8x32xf32>
    %272 = vector.extract_strided_slice %262 {offsets = [0, 32], sizes = [8, 32], strides = [1, 1]} : vector<8x96xf32> to vector<8x32xf32>
    %273 = vector.extract_strided_slice %263 {offsets = [0, 32], sizes = [8, 32], strides = [1, 1]} : vector<8x96xf32> to vector<8x32xf32>
    %274 = arith.addf %272, %273 : vector<8x32xf32>
    %275 = arith.negf %274 : vector<8x32xf32>
    %276 = math.exp %275 : vector<8x32xf32>
    %cst_72 = arith.constant 1.000000e+00 : f32
    %277 = vector.broadcast %cst_72 : f32 to vector<8x32xf32>
    %278 = arith.addf %277, %276 : vector<8x32xf32>
    %279 = arith.divf %277, %278 : vector<8x32xf32>
    %280 = vector.extract_strided_slice %262 {offsets = [0, 64], sizes = [8, 32], strides = [1, 1]} : vector<8x96xf32> to vector<8x32xf32>
    %281 = vector.extract_strided_slice %263 {offsets = [0, 64], sizes = [8, 32], strides = [1, 1]} : vector<8x96xf32> to vector<8x32xf32>
    %282 = vector.broadcast %27 : vector<1x32xf32> to vector<8x32xf32>
    %283 = arith.addf %281, %282 : vector<8x32xf32>
    %284 = arith.mulf %271, %283 : vector<8x32xf32>
    %285 = arith.addf %280, %284 : vector<8x32xf32>
    %286 = math.tanh %285 : vector<8x32xf32>
    %cst_73 = arith.constant 1.000000e+00 : f32
    %287 = vector.broadcast %cst_73 : f32 to vector<8x32xf32>
    %288 = arith.subf %287, %279 : vector<8x32xf32>
    %289 = arith.mulf %288, %286 : vector<8x32xf32>
    %290 = arith.mulf %279, %253 : vector<8x32xf32>
    %291 = arith.addf %289, %290 : vector<8x32xf32>
    %292 = vector.broadcast %c6_i32 : i32 to vector<8x1xi32>
    %293 = arith.cmpi eq, %28, %292 : vector<8x1xi32>
    %294 = vector.shape_cast %293 : vector<8x1xi1> to vector<8x1xi1>
    %295 = vector.broadcast %294 : vector<8x1xi1> to vector<8x32xi1>
    %296 = arith.select %295, %291, %258 : vector<8x32xi1>, vector<8x32xf32>
    %c7_i32 = arith.constant 7 : i32
    %c8_i32_74 = arith.constant 8 : i32
    %297 = arith.muli %c7_i32, %c8_i32_74 : i32
    %298 = tpu.assume_multiple %297, 8 : i32
    %299 = arith.index_cast %298 : i32 to index
    %c0_75 = arith.constant 0 : index
    %300 = vector.load %arg19[%299, %c0_75] : memref<64x96xf32, #tpu.memory_space<vmem>>, vector<8x96xf32>
    %cst_76 = arith.constant dense<0.000000e+00> : vector<8x96xf32>
    %301 = tpu.matmul %291, %26, %cst_76 {dimension_numbers = #tpu.dot_dimension_numbers<[1], [0], [0], [1], [0, 0, 1, 1], [], []>} : vector<8x32xf32>, vector<32x96xf32>, vector<8x96xf32> -> vector<8x96xf32>
    %302 = vector.extract_strided_slice %300 {offsets = [0, 0], sizes = [8, 32], strides = [1, 1]} : vector<8x96xf32> to vector<8x32xf32>
    %303 = vector.extract_strided_slice %301 {offsets = [0, 0], sizes = [8, 32], strides = [1, 1]} : vector<8x96xf32> to vector<8x32xf32>
    %304 = arith.addf %302, %303 : vector<8x32xf32>
    %305 = arith.negf %304 : vector<8x32xf32>
    %306 = math.exp %305 : vector<8x32xf32>
    %cst_77 = arith.constant 1.000000e+00 : f32
    %307 = vector.broadcast %cst_77 : f32 to vector<8x32xf32>
    %308 = arith.addf %307, %306 : vector<8x32xf32>
    %309 = arith.divf %307, %308 : vector<8x32xf32>
    %310 = vector.extract_strided_slice %300 {offsets = [0, 32], sizes = [8, 32], strides = [1, 1]} : vector<8x96xf32> to vector<8x32xf32>
    %311 = vector.extract_strided_slice %301 {offsets = [0, 32], sizes = [8, 32], strides = [1, 1]} : vector<8x96xf32> to vector<8x32xf32>
    %312 = arith.addf %310, %311 : vector<8x32xf32>
    %313 = arith.negf %312 : vector<8x32xf32>
    %314 = math.exp %313 : vector<8x32xf32>
    %cst_78 = arith.constant 1.000000e+00 : f32
    %315 = vector.broadcast %cst_78 : f32 to vector<8x32xf32>
    %316 = arith.addf %315, %314 : vector<8x32xf32>
    %317 = arith.divf %315, %316 : vector<8x32xf32>
    %318 = vector.extract_strided_slice %300 {offsets = [0, 64], sizes = [8, 32], strides = [1, 1]} : vector<8x96xf32> to vector<8x32xf32>
    %319 = vector.extract_strided_slice %301 {offsets = [0, 64], sizes = [8, 32], strides = [1, 1]} : vector<8x96xf32> to vector<8x32xf32>
    %320 = vector.broadcast %27 : vector<1x32xf32> to vector<8x32xf32>
    %321 = arith.addf %319, %320 : vector<8x32xf32>
    %322 = arith.mulf %309, %321 : vector<8x32xf32>
    %323 = arith.addf %318, %322 : vector<8x32xf32>
    %324 = math.tanh %323 : vector<8x32xf32>
    %cst_79 = arith.constant 1.000000e+00 : f32
    %325 = vector.broadcast %cst_79 : f32 to vector<8x32xf32>
    %326 = arith.subf %325, %317 : vector<8x32xf32>
    %327 = arith.mulf %326, %324 : vector<8x32xf32>
    %328 = arith.mulf %317, %291 : vector<8x32xf32>
    %329 = arith.addf %327, %328 : vector<8x32xf32>
    %330 = vector.broadcast %c7_i32 : i32 to vector<8x1xi32>
    %331 = arith.cmpi eq, %28, %330 : vector<8x1xi32>
    %332 = vector.shape_cast %331 : vector<8x1xi1> to vector<8x1xi1>
    %333 = vector.broadcast %332 : vector<8x1xi1> to vector<8x32xi1>
    %334 = arith.select %333, %329, %296 : vector<8x32xi1>, vector<8x32xf32>
    %c8_i32_80 = arith.constant 8 : i32
    %c0_81 = arith.constant 0 : index
    %c0_82 = arith.constant 0 : index
    %335 = vector.load %arg14[%c0_81, %c0_82] : memref<32x32xf32, #tpu.memory_space<vmem>>, vector<32x32xf32>
    %cst_83 = arith.constant dense<0.000000e+00> : vector<8x32xf32>
    %336 = tpu.matmul %334, %335, %cst_83 {dimension_numbers = #tpu.dot_dimension_numbers<[1], [0], [0], [1], [0, 0, 1, 1], [], []>} : vector<8x32xf32>, vector<32x32xf32>, vector<8x32xf32> -> vector<8x32xf32>
    %c0_84 = arith.constant 0 : index
    %c0_85 = arith.constant 0 : index
    %337 = vector.load %arg15[%c0_84, %c0_85] : memref<1x32xf32, #tpu.memory_space<vmem>>, vector<1x32xf32>
    %338 = vector.broadcast %337 : vector<1x32xf32> to vector<8x32xf32>
    %339 = arith.addf %336, %338 : vector<8x32xf32>
    %340 = math.tanh %339 : vector<8x32xf32>
    %c0_86 = arith.constant 0 : index
    %c0_87 = arith.constant 0 : index
    %341 = vector.load %arg16[%c0_86, %c0_87] : memref<32x32xf32, #tpu.memory_space<vmem>>, vector<32x32xf32>
    %cst_88 = arith.constant dense<0.000000e+00> : vector<8x32xf32>
    %342 = tpu.matmul %340, %341, %cst_88 {dimension_numbers = #tpu.dot_dimension_numbers<[1], [0], [0], [1], [0, 0, 1, 1], [], []>} : vector<8x32xf32>, vector<32x32xf32>, vector<8x32xf32> -> vector<8x32xf32>
    %c0_89 = arith.constant 0 : index
    %c0_90 = arith.constant 0 : index
    %343 = vector.load %arg17[%c0_89, %c0_90] : memref<1x32xf32, #tpu.memory_space<vmem>>, vector<1x32xf32>
    %344 = vector.broadcast %343 : vector<1x32xf32> to vector<8x32xf32>
    %345 = arith.addf %342, %344 : vector<8x32xf32>
    %346 = arith.mulf %345, %11 : vector<8x32xf32>
    %cst_91 = arith.constant dense<0.000000e+00> : vector<8xf32>
    %347 = vector.multi_reduction <add>, %346, %cst_91 [1] : vector<8x32xf32> to vector<8xf32>
    %348 = vector.shape_cast %347 : vector<8xf32> to vector<8x1xf32>
    %c0_92 = arith.constant 0 : index
    %c0_93 = arith.constant 0 : index
    %349 = vector.load %arg18[%c0_92, %c0_93] : memref<8x1xf32, #tpu.memory_space<vmem>>, vector<8x1xf32>
    tpu.vector_store %arg18[%c0_92, %c0_93], %348 {strides = array<i32>} : memref<8x1xf32, #tpu.memory_space<vmem>>, vector<8x1xf32>,
    return
  }
  func.func @transform_0(%arg0: i32) -> (i32, i32, i32) {
    %c0_i32 = arith.constant 0 : i32
    %c0_i32_0 = arith.constant 0 : i32
    %c0_i32_1 = arith.constant 0 : i32
    return %c0_i32, %arg0, %c0_i32_0 : i32, i32, i32
  }
  func.func @transform_1(%arg0: i32) -> (i32, i32) {
    %c0_i32 = arith.constant 0 : i32
    %c0_i32_0 = arith.constant 0 : i32
    return %arg0, %c0_i32 : i32, i32
  }
  func.func @transform_2(%arg0: i32) -> (i32, i32) {
    %c0_i32 = arith.constant 0 : i32
    %c0_i32_0 = arith.constant 0 : i32
    return %arg0, %c0_i32 : i32, i32
  }
  func.func @transform_3(%arg0: i32) -> (i32, i32) {
    %c0_i32 = arith.constant 0 : i32
    %c0_i32_0 = arith.constant 0 : i32
    %c0_i32_1 = arith.constant 0 : i32
    return %c0_i32, %c0_i32_0 : i32, i32
  }
  func.func @transform_4(%arg0: i32) -> (i32, i32) {
    %c0_i32 = arith.constant 0 : i32
    %c0_i32_0 = arith.constant 0 : i32
    %c0_i32_1 = arith.constant 0 : i32
    return %c0_i32, %c0_i32_0 : i32, i32
  }
  func.func @transform_5(%arg0: i32) -> (i32, i32) {
    %c0_i32 = arith.constant 0 : i32
    %c0_i32_0 = arith.constant 0 : i32
    %c0_i32_1 = arith.constant 0 : i32
    return %c0_i32, %c0_i32_0 : i32, i32
  }
  func.func @transform_6(%arg0: i32) -> (i32, i32) {
    %c0_i32 = arith.constant 0 : i32
    %c0_i32_0 = arith.constant 0 : i32
    %c0_i32_1 = arith.constant 0 : i32
    return %c0_i32, %c0_i32_0 : i32, i32
  }
  func.func @transform_7(%arg0: i32) -> (i32, i32) {
    %c0_i32 = arith.constant 0 : i32
    %c0_i32_0 = arith.constant 0 : i32
    %c0_i32_1 = arith.constant 0 : i32
    return %c0_i32, %c0_i32_0 : i32, i32
  }
  func.func @transform_8(%arg0: i32) -> (i32, i32) {
    %c0_i32 = arith.constant 0 : i32
    %c0_i32_0 = arith.constant 0 : i32
    %c0_i32_1 = arith.constant 0 : i32
    return %c0_i32, %c0_i32_0 : i32, i32
  }
  func.func @transform_9(%arg0: i32) -> (i32, i32) {
    %c0_i32 = arith.constant 0 : i32
    %c0_i32_0 = arith.constant 0 : i32
    %c0_i32_1 = arith.constant 0 : i32
    return %c0_i32, %c0_i32_0 : i32, i32
  }
  func.func @transform_10(%arg0: i32) -> (i32, i32) {
    %c0_i32 = arith.constant 0 : i32
    %c0_i32_0 = arith.constant 0 : i32
    %c0_i32_1 = arith.constant 0 : i32
    return %c0_i32, %c0_i32_0 : i32, i32
  }
  func.func @transform_11(%arg0: i32) -> (i32, i32) {
    %c0_i32 = arith.constant 0 : i32
    %c0_i32_0 = arith.constant 0 : i32
    %c0_i32_1 = arith.constant 0 : i32
    return %c0_i32, %c0_i32_0 : i32, i32
  }
  func.func @transform_12(%arg0: i32) -> (i32, i32) {
    %c0_i32 = arith.constant 0 : i32
    %c0_i32_0 = arith.constant 0 : i32
    %c0_i32_1 = arith.constant 0 : i32
    return %c0_i32, %c0_i32_0 : i32, i32
  }
  func.func @transform_13(%arg0: i32) -> (i32, i32) {
    %c0_i32 = arith.constant 0 : i32
    %c0_i32_0 = arith.constant 0 : i32
    %c0_i32_1 = arith.constant 0 : i32
    return %c0_i32, %c0_i32_0 : i32, i32
  }
  func.func @transform_14(%arg0: i32) -> (i32, i32) {
    %c0_i32 = arith.constant 0 : i32
    %c0_i32_0 = arith.constant 0 : i32
    %c0_i32_1 = arith.constant 0 : i32
    return %c0_i32, %c0_i32_0 : i32, i32
  }
  func.func @transform_15(%arg0: i32) -> (i32, i32) {
    %c0_i32 = arith.constant 0 : i32
    %c0_i32_0 = arith.constant 0 : i32
    %c0_i32_1 = arith.constant 0 : i32
    return %c0_i32, %c0_i32_0 : i32, i32
  }
  func.func @transform_16(%arg0: i32) -> (i32, i32) {
    %c0_i32 = arith.constant 0 : i32
    %c0_i32_0 = arith.constant 0 : i32
    %c0_i32_1 = arith.constant 0 : i32
    return %c0_i32, %c0_i32_0 : i32, i32
  }
  func.func @transform_17(%arg0: i32) -> (i32, i32) {
    %c0_i32 = arith.constant 0 : i32
    %c0_i32_0 = arith.constant 0 : i32
    return %arg0, %c0_i32 : i32, i32
  }
}

</mosaic_0001>

<bundles_post_ra>
// kernel: _lambda_.1
= control target key start
LH: loop header
LB: loop body
LE: loop exit
PB: predicated region body
PF: predicated region fallthrough
CT: control target
= control target key end

     0   :  { %s3253_s0 = inlined_call_operand.vmem [shape: f32[8,16,32], index: 0, kind: input, shape index: {}]   ;;  %s3254_s1 = inlined_call_operand.vmem [shape: f32[16,32], index: 1, kind: input, shape index: {}]   ;;  %s3255_s2 = inlined_call_operand.vmem [shape: s32[16,1], index: 2, kind: input, shape index: {}]   ;;  %s3256_s3 = inlined_call_operand.vmem [shape: f32[32,32], index: 3, kind: input, shape index: {}]   ;;  %s3257_s4 = inlined_call_operand.vmem [shape: f32[1,32], index: 4, kind: input, shape index: {}]   ;;  %s3258_s5 = inlined_call_operand.vmem [shape: f32[32,32], index: 5, kind: input, shape index: {}]   ;;  %s3259_s6 = inlined_call_operand.vmem [shape: f32[1,32], index: 6, kind: input, shape index: {}]   ;;  %s3260_s7 = inlined_call_operand.vmem [shape: f32[32,32], index: 7, kind: input, shape index: {}]   ;;  %s3261_s8 = inlined_call_operand.vmem [shape: f32[1,32], index: 8, kind: input, shape index: {}]   ;;  %s3262_s9 = inlined_call_operand.vmem [shape: f32[32,96], index: 9, kind: input, shape index: {}]   ;;  %s3263_s10 = inlined_call_operand.vmem [shape: f32[1,96], index: 10, kind: input, shape index: {}]   ;;  %s3264_s11 = inlined_call_operand.vmem [shape: f32[32,96], index: 11, kind: input, shape index: {}]   ;;  %s3265_s12 = inlined_call_operand.vmem [shape: f32[1,32], index: 12, kind: input, shape index: {}]   ;;  %s3266_s13 = inlined_call_operand.vmem [shape: f32[32,32], index: 13, kind: input, shape index: {}]   ;;  %s3267_s14 = inlined_call_operand.vmem [shape: f32[1,32], index: 14, kind: input, shape index: {}]   ;;  %s3268_s15 = inlined_call_operand.vmem [shape: f32[32,32], index: 15, kind: input, shape index: {}]   ;;  %s3269_s16 = inlined_call_operand.vmem [shape: f32[1,32], index: 16, kind: input, shape index: {}]   ;;  %s3270_s17 = inlined_call_operand.vmem [shape: f32[16,1], index: 17, kind: output, shape index: {}]  }
   0x1   :  { %3271 = sst [smem:[#allocation4_spill]] %s3253_s0 }
   0x2   :  { %3272 = sst [smem:[#allocation5_spill]] %s3254_s1 }
   0x3   :  { %s2897_s24 = smov 0   ;;  %s2899_s25 = smov 0  }
   0x4   :  { %s2901_s26 = smov 0  }
   0x5 LB: > { %s2278_s27 = sadd.s32 4294967295, %s2799_s26   ;;  %s2914_s28 = sadd.s32 1, %s2799_s26   ;;  %s2799_s26 = sphi %s2901_s26, %s3277_s26   ;;  %s2795_s25 = sphi %s2899_s25, %s3276_s25   ;;  %s2791_s24 = sphi %s2897_s24, %s3275_s24  }
   0x6   : > { %s31_s29 = ssub.s32 %s2799_s26, %s2914_s28  ;;  %s34_s0 = sadd.s32 1, %s2795_s25 }
   0x7   : > { %p32_p0 = scmp.eq.s32.totalorder %s31_s29, 0  ;;  %p41_p1 = scmp.ne.s32.totalorder %s2795_s25, %s2791_s24 }
   0x8   : > { %p42_p2 = scmp.eq.s32.totalorder %s2799_s26, 0  ;;  %p2281_p4 = scmp.ge.s32.totalorder %s2799_s26, 2 }
   0x9   : > { %s2923_s30 = scalar_select %p32_p0, %s2795_s25, %s34_s0  }
   0xa   : > { %p43_p3 = por %p42_p2, %p41_p1  ;;  %481 = sbr.rel (%p2281_p4) target bundleno = 31 (0x1f), region = 72 }
  0x11   : > { %484 = sbr.rel (!%p43_p3) target bundleno = 31 (0x1f), region = 76  ;;  %s486_s18 = sand.u32 (%p43_p3), 1, %s2795_s25  }
  0x12   : > { %s2283_s19 = sshll.u32 (%p43_p3), %s2799_s26, 3  ;;  %s2282_s1 = sshll.u32 (%p43_p3), %s486_s18, 6 }
  0x13   : > { %s3273_s22 = sld [smem:[#allocation4_spill]] (%p43_p3)  ;;  %s488_s29 = scalar_lea.vmem (%p43_p3), [#allocation3], %s2282_s1 }
  0x19   : > { %s490_s23 = scalar_lea.vmem %s3273_s22, %s2283_s19 }
  0x1a   : > { %v532_v0 = vld [vmem:[%s490_s23] sm:$0xff]  ;;  %v534_v1 = vld [vmem:[%s490_s23 + $0x10] sm:$0xff] }
  0x1b   : > { %v536_v2 = vld [vmem:[%s490_s23 + $0x20] sm:$0xff]  ;;  %533 = vst [vmem:[%s488_s29] sm:$0xff] %v532_v0  ;;  %535 = vst [vmem:[%s488_s29 + $0x8] sm:$0xff] %v534_v1  ;;  %v538_v3 = vld [vmem:[%s490_s23 + $0x30] sm:$0xff] }
  0x1c   : > { %537 = vst [vmem:[%s488_s29 + $0x10] sm:$0xff] %v536_v2  ;;  %v540_v4 = vld [vmem:[%s490_s23 + $0x40] sm:$0xff]  ;;  %v542_v5 = vld [vmem:[%s490_s23 + $0x50] sm:$0xff]  ;;  %539 = vst [vmem:[%s488_s29 + $0x18] sm:$0xff] %v538_v3 }
  0x1d   : > { %541 = vst [vmem:[%s488_s29 + $0x20] sm:$0xff] %v540_v4  ;;  %543 = vst [vmem:[%s488_s29 + $0x28] sm:$0xff] %v542_v5  ;;  %v544_v6 = vld [vmem:[%s490_s23 + $0x60] sm:$0xff]  ;;  %v546_v7 = vld [vmem:[%s490_s23 + $0x70] sm:$0xff] }
  0x1e   : > { %545 = vst [vmem:[%s488_s29 + $0x30] sm:$0xff] %v544_v6  ;;  %547 = vst [vmem:[%s488_s29 + $0x38] sm:$0xff] %v546_v7 }
  0x1f PF: > { %p2284_p5 = scmp.ge.s32.totalorder %s2799_s26, 1  ;;  %p566_p6 = scmp.lt.s32.totalorder %s2799_s26, 3 }
  0x21   : > { %p567_p7 = pnand %p2284_p5, %p566_p6 }
  0x22   : > { %v644_v8 = vld [vmem:[%s3258_s5] sm:$0xff] (!%p567_p7)  ;;  %v645_v9 = vld [vmem:[%s3258_s5 + $0x8] sm:$0xff] (!%p567_p7)  ;;  %v646_v10 = vld [vmem:[%s3258_s5 + $0x10] sm:$0xff] (!%p567_p7)  ;;  %v2801_v11 = vmov (!%p567_p7), 0.0|0.0   ;;  %vm2802_vm0 = vmmov (!%p567_p7), 0   ;;  %v2803_v14 = vmov (!%p567_p7), 0.0  }
  0x23   : > { %570 = sbr.rel (%p567_p7) target bundleno = 6333 (0x18bd), region = 122  ;;  %2589 = vmatprep.subr.bf16.mxu0 (!%p567_p7), %v2801_v11  ;;  %v2590_v12 = vpack.c.bf16 (!%p567_p7), %v645_v9, %v644_v8  ;;  %v647_v13 = vld [vmem:[%s3258_s5 + $0x18] sm:$0xff] (!%p567_p7)  ;;  %2425 = vmatprep.mubr.msk.f32.mxu0 (!%p567_p7), %vm2802_vm0, %v2803_v14  ;;  %p631_p8 = scmp.lt.s32.totalorder (!%p567_p7), %s2278_s27, 1  ;;  %v822_v15 = vld [vmem:[%s3256_s3] sm:$0xff] (!%p567_p7)  ;;  %v823_v16 = vld [vmem:[%s3256_s3 + $0x8] sm:$0xff] (!%p567_p7)  ;;  %vm655_vm1 = vcmask (!%p567_p7), 261120  }
  0x24   : > { %s573_s1 = sand.u32 (!%p567_p7), 1, %s2791_s24   ;;  %2595 = vmatprep.subr.bf16.mxu1 (!%p567_p7), %v2801_v11  ;;  %2436 = vmatprep.mubr.msk.f32.mxu1 (!%p567_p7), %vm2802_vm0, %v2803_v14  ;;  %v2593_v17 = vpack.c.bf16 (!%p567_p7), %v647_v13, %v646_v10  ;;  %v2601_v18 = vpack.c.bf16 (!%p567_p7), %v823_v16, %v822_v15  ;;  %v824_v19 = vld [vmem:[%s3256_s3 + $0x10] sm:$0xff] (!%p567_p7)  ;;  %v825_v20 = vld [vmem:[%s3256_s3 + $0x18] sm:$0xff] (!%p567_p7)  ;;  %s3274_s19 = sld [smem:[#allocation5_spill]] (!%p567_p7)  ;;  %v1119_v24 = vld [vmem:[%s3264_s11] sm:$0xff] (!%p567_p7)  ;;  %vm1110_vm2 = vcmask (!%p567_p7), 785408  }
  0x25   : > { %s2285_s20 = sshll.u32 (!%p567_p7), %s573_s1, 6  ;;  %2591 = vmatpush3.bf16.msra.mxu0 (!%p567_p7), %v2590_v12  ;;  %v2605_v22 = vpack.c.bf16 (!%p567_p7), %v825_v20, %v824_v19  ;;  %v1120_v25 = vld [vmem:[%s3264_s11 + $0x8] sm:$0xff] (!%p567_p7)  ;;  %v1121_v29 = vld [vmem:[%s3264_s11 + $0x10] sm:$0xff] (!%p567_p7)  ;;  %v1122_v30 = vld [vmem:[%s3264_s11 + $0x18] sm:$0xff] (!%p567_p7)  ;;  %s2805_s22 = smov (!%p567_p7), 96  }
  0x26   : > { %2592 = vmatprep.subr.bf16.mxu0 (!%p567_p7), %v2801_v11  ;;  %s575_s26 = scalar_lea.vmem (!%p567_p7), [#allocation3], %s2285_s20  ;;  %v2983_v27 = vpack.c.bf16 (!%p567_p7), %v1120_v25, %v1119_v24  ;;  %v2995_v32 = vpack.c.bf16 (!%p567_p7), %v1122_v30, %v1121_v29  ;;  %v730_v37 = vld [vmem:[%s3260_s7] sm:$0xff] (!%p567_p7)  ;;  %v731_v38 = vld [vmem:[%s3260_s7 + $0x8] sm:$0xff] (!%p567_p7)  ;;  %v732_v40 = vld [vmem:[%s3260_s7 + $0x10] sm:$0xff] (!%p567_p7) }
  0x27   : > { %v814_v23 = vld [vmem:[%s575_s26] sm:$0xff] (!%p567_p7)  ;;  %v815_v26 = vld [vmem:[%s575_s26 + $0x8] sm:$0xff] (!%p567_p7)  ;;  %v816_v28 = vld [vmem:[%s575_s26 + $0x10] sm:$0xff] (!%p567_p7)  ;;  %v2596_v39 = vpack.c.bf16 (!%p567_p7), %v731_v38, %v730_v37 }
  0x28   : > { %v817_v31 = vld [vmem:[%s575_s26 + $0x18] sm:$0xff] (!%p567_p7)  ;;  %v818_v33 = vld [vmem:[%s575_s26 + $0x20] sm:$0xff] (!%p567_p7)  ;;  %v819_v34 = vld [vmem:[%s575_s26 + $0x28] sm:$0xff] (!%p567_p7) }
  0x29   : > { %2594 = vmatpush3.bf16.msra.mxu0 (!%p567_p7), %v2593_v17  ;;  %v820_v35 = vld [vmem:[%s575_s26 + $0x30] sm:$0xff] (!%p567_p7)  ;;  %v821_v36 = vld [vmem:[%s575_s26 + $0x38] sm:$0xff] (!%p567_p7)  ;;  %2597 = vmatpush3.bf16.msra.mxu1 (!%p567_p7), %v2596_v39  ;;  %v970_v43 = vld [vmem:[%s3262_s9] sm:$0xff] (!%p567_p7) }
  0x2a   : > { %s3279_s27 = smov (!%p631_p8, %s2278_s27), 1  ;;  %2602 = vmatprep.subr.bf16.mxu0 %v2601_v18  ;;  %2598 = vmatprep.subr.bf16.mxu1 %v2801_v11  ;;  %v733_v41 = vld [vmem:[%s3260_s7 + $0x18] sm:$0xff]  ;;  %v971_v44 = vld [vmem:[%s3262_s9 + $0x8] sm:$0xff]  ;;  %v2312_v46 = vld [vmem:[%s3265_s12] ss:$0 sm:$0xff] }
  0x2b   : > { %s2963_s21 = sshll.u32 %s3279_s27, 3  ;;  %v2599_v42 = vpack.c.bf16 %v733_v41, %v732_v40  ;;  %v2609_v45 = vpack.c.bf16 %v971_v44, %v970_v43  ;;  %s2804_s27 = smov 64   ;;  %v2289_v47 = vld [vmem:[%s3259_s6] ss:$0 sm:$0xff]  ;;  %v972_v55 = vld [vmem:[%s3262_s9 + $0x10] sm:$0xff]  ;;  %v973_v56 = vld [vmem:[%s3262_s9 + $0x18] sm:$0xff] }
  0x2c   : > { %s634_s1 = scalar_lea.vmem %s3274_s19, %s2963_s21  ;;  %1211 = vrot.lane.b32.xlu0 %v2312_v46, %s2804_s27  ;;  %v2293_v51 = vld [vmem:[%s3257_s4] ss:$0 sm:$0xff]  ;;  %v2613_v58 = vpack.c.bf16 %v973_v56, %v972_v55  ;;  %s638_s20 = scalar_lea.vmem %s3255_s2, %s2963_s21 }
  0x2d   : > { %v643_v21 = vld [vmem:[%s634_s1] sm:$0xff]  ;;  %2600 = vmatpush3.bf16.msra.mxu1 %v2599_v42  ;;  %s642_s19 = scalar_lea.vmem %s3270_s17, %s2963_s21 }
  0x2e   : > { %2426 = vmatmul.mubr.msk.f32.vlgmr.msra.gmra.mrb[0].mxu0 %vm655_vm1, %v643_v21  ;;  %2610 = vmatprep.subr.bf16.mxu1 %v2609_v45  ;;  %v2302_v24 = vld [vmem:[%s3263_s10] ss:$0 sm:$0xff] }
  0x2f   : > { %2604 = vmatpush3.bf16.msra.mxu0 %v2601_v18  ;;  %2447 = vmatprep.mubr.msk.f32.mxu0 %vm655_vm1, %v814_v23 }
  0x30   : > { %2606 = vmatprep.subr.bf16.mxu0 %v2605_v22 }
  0x33   : > { %2608 = vmatpush3.bf16.msra.mxu0 %v2605_v22 }
  0x34   : > { %2617 = vmatprep.subr.bf16.mxu0 %v2801_v11 }
  0x36   : > { %2448 = vmatmul.mubr.msk.f32.vlgmr.msra.gmra.mrb[2].mxu0 %vm655_vm1, %v815_v26 }
  0x37   : > { %2450 = vmatprep.mubr.msk.f32.mxu0 %vm655_vm1, %v816_v28  ;;  %2619 = vmatpush3.bf16.msra.mxu0 %v2983_v27 }
  0x38   : > { %2620 = vmatprep.subr.bf16.mxu0 %v2801_v11 }
  0x3a   : > { %2451 = vmatmul.mubr.msk.f32.gmra.mrb[4].mxu0 %vm655_vm1, %v817_v31 }
  0x3b   : > { %2453 = vmatprep.mubr.msk.f32.mxu0 %vm655_vm1, %v818_v33  ;;  %2622 = vmatpush3.bf16.msra.mxu0 %v2995_v32 }
  0x3c   : > { %2629 = vmatprep.subr.bf16.mxu0 %v2801_v11 }
  0x3e   : > { %2454 = vmatmul.mubr.msk.f32.gmra.mrb[6].mxu0 %vm655_vm1, %v819_v34 }
  0x3f   : > { %2456 = vmatprep.mubr.msk.f32.mxu0 %vm655_vm1, %v820_v35 }
  0x42   : > { %2457 = vmatmul.mubr.msk.f32.gmra.mrb[8].mxu0 %vm655_vm1, %v821_v36 }
  0x43   : > { %2487 = vmatprep.mubr.msk.f32.mxu0 %vm2802_vm0, %v2803_v14 }
  0x46   : > { %2488 = vmatmul.mubr.f32.vlgmr.msra.gmra.mrb[10].mxu0 %v2803_v14 }
  0x47   : > { %2631 = vmatpush3.bf16.msra.mxu0 %v2983_v27  ;;  %2509 = vmatprep.mubr.msk.f32.mxu0 %vm2802_vm0, %v2803_v14 }
  0x48   : > { %2632 = vmatprep.subr.bf16.mxu0 %v2801_v11 }
  0x4b   : > { %2634 = vmatpush3.bf16.msra.mxu0 %v2995_v32 }
  0x4c   : > { %2641 = vmatprep.subr.bf16.mxu0 %v2801_v11 }
  0x9e   : > { %v3051_v9 = vpop.permute.xlu0 %1211 }
 0x101   : > { %v725_v48 = vpop.f32.mrb[0].mxu0 }
 0x102   : > { %v726_v49 = vadd.f32 %v2289_v47, %v725_v48  ;;  %v2427_v50 = vpop.f32.mrb[1].mxu0 }
 0x104   : > { %2709 = vtanh.f32 %v726_v49 }
 0x109   : > { %v2449_v52 = vpop.f32.mrb[2].mxu0 }
 0x10a   : > { %v929_v53 = vadd.f32 %v2449_v52, %v2293_v51  ;;  %v923_v54 = vpop.f32.mrb[3].mxu0 }
 0x10b   : > { %v924_v57 = vadd.f32 %v2293_v51, %v923_v54 }
 0x10d   : > { %2711 = vtanh.f32 %v924_v57  ;;  %v2452_v59 = vpop.f32.mrb[4].mxu0 }
 0x10e   : > { %v2710_v60 = vpop.eup %2709  ;;  %2713 = vtanh.f32 %v929_v53  ;;  %v939_v61 = vadd.f32 %v2452_v59, %v2293_v51  ;;  %v933_v62 = vpop.f32.mrb[5].mxu0 }
 0x10f   : > { %2437 = vmatmul.mubr.msk.f32.vlgmr.msra.gmra.mrb[0].mxu1 %vm655_vm1, %v2710_v60  ;;  %v934_v63 = vadd.f32 %v2293_v51, %v933_v62 }
 0x110   : > { %2612 = vmatpush3.bf16.msra.mxu1 %v2609_v45  ;;  %2715 = vtanh.f32 %v939_v61 }
 0x111   : > { %2614 = vmatprep.subr.bf16.mxu1 %v2613_v58  ;;  %2717 = vtanh.f32 %v934_v63  ;;  %v2455_v0 = vpop.f32.mrb[6].mxu0 }
 0x112   : > { %v949_v1 = vadd.f32 %v2455_v0, %v2293_v51  ;;  %v943_v2 = vpop.f32.mrb[7].mxu0 }
 0x113   : > { %v944_v3 = vadd.f32 %v2293_v51, %v943_v2 }
 0x114   : > { %2616 = vmatpush3.bf16.msra.mxu1 %v2613_v58  ;;  %2719 = vtanh.f32 %v949_v1 }
 0x115   : > { %2721 = vtanh.f32 %v944_v3  ;;  %v2458_v4 = vpop.f32.mrb[8].mxu0  ;;  %2623 = vmatprep.subr.bf16.mxu1 %v2801_v11 }
 0x116   : > { %v959_v5 = vadd.f32 %v2458_v4, %v2293_v51  ;;  %v953_v6 = vpop.f32.mrb[9].mxu0 }
 0x117   : > { %v2712_v7 = vpop.eup %2711  ;;  %v954_v8 = vadd.f32 %v2293_v51, %v953_v6 }
 0x118   : > { %v2714_v10 = vpop.eup %2713  ;;  %2467 = vmatprep.mubr.msk.f32.mxu1 %vm655_vm1, %v2712_v7  ;;  %2723 = vtanh.f32 %v959_v5 }
 0x119   : > { %2468 = vmatmul.mubr.msk.f32.vlgmr.msra.gmra.mrb[2].mxu1 %vm655_vm1, %v2714_v10  ;;  %2725 = vtanh.f32 %v954_v8  ;;  %v1195_v12 = vpop.f32.mrb[10].mxu0 }
 0x11a   : > { %v2716_v13 = vpop.eup %2715  ;;  %v2489_v15 = vpop.f32.mrb[11].mxu0  ;;  %v1214_v16 = vadd.f32 %v3051_v9, %v1195_v12  ;;  %2625 = vmatpush3.bf16.msra.mxu1 %v2983_v27 }
 0x11b   : > { %v2718_v17 = vpop.eup %2717  ;;  %2626 = vmatprep.subr.bf16.mxu1 %v2801_v11 }
 0x11c   : > { %2470 = vmatprep.mubr.msk.f32.mxu1 %vm655_vm1, %v2718_v17  ;;  %1216 = vrot.lane.b32.xlu0 %v1214_v16, %s2804_s27 }
 0x11d   : > { %2471 = vmatmul.mubr.msk.f32.gmra.mrb[4].mxu1 %vm655_vm1, %v2716_v13 }
 0x11e   : > { %v2720_v18 = vpop.eup %2719  ;;  %2628 = vmatpush3.bf16.msra.mxu1 %v2995_v32 }
 0x11f   : > { %v2722_v19 = vpop.eup %2721  ;;  %2635 = vmatprep.subr.bf16.mxu1 %v2801_v11 }
 0x120   : > { %2473 = vmatprep.mubr.msk.f32.mxu1 %vm655_vm1, %v2722_v19 }
 0x121   : > { %2474 = vmatmul.mubr.msk.f32.gmra.mrb[6].mxu1 %vm655_vm1, %v2720_v18 }
 0x122   : > { %v2724_v20 = vpop.eup %2723 }
 0x123   : > { %v2726_v21 = vpop.eup %2725 }
 0x124   : > { %2476 = vmatprep.mubr.msk.f32.mxu1 %vm655_vm1, %v2726_v21 }
 0x125   : > { %2477 = vmatmul.mubr.msk.f32.gmra.mrb[8].mxu1 %vm655_vm1, %v2724_v20 }
 0x126   : > { %2498 = vmatprep.mubr.msk.f32.mxu1 %vm2802_vm0, %v2803_v14 }
 0x18e   : > { %v1217_v48 = vpop.permute.xlu0 %1216 }
 0x1e2   : > { %v3069_v22 = vpop.f32.mrb[0].mxu1 }
 0x1e3   : > { %v2438_v23 = vpop.f32.mrb[1].mxu1 }
 0x1ec   : > { %v2469_v25 = vpop.f32.mrb[2].mxu1 }
 0x1ed   : > { %v1077_v26 = vadd.f32 %v2469_v25, %v2302_v24  ;;  %v1071_v28 = vpop.f32.mrb[3].mxu1 }
 0x1ee   : > { %v1072_v29 = vadd.f32 %v2302_v24, %v1071_v28 }
 0x1ef   : > { %1112 = vst.msk [vmem:[#allocation2 + $0x8] sm:$0xff] %vm1110_vm2, %v1077_v26 }
 0x1f0   : > { %1111 = vst.msk [vmem:[#allocation2] sm:$0xff] %vm1110_vm2, %v1072_v29  ;;  %v2472_v30 = vpop.f32.mrb[4].mxu1 }
 0x1f1   : > { %v1087_v31 = vadd.f32 %v2472_v30, %v2302_v24  ;;  %v1081_v33 = vpop.f32.mrb[5].mxu1 }
 0x1f2   : > { %v1082_v34 = vadd.f32 %v2302_v24, %v1081_v33 }
 0x1f3   : > { %1114 = vst.msk [vmem:[#allocation2 + $0x18] sm:$0xff] %vm1110_vm2, %v1087_v31 }
 0x1f4   : > { %1113 = vst.msk [vmem:[#allocation2 + $0x10] sm:$0xff] %vm1110_vm2, %v1082_v34  ;;  %v2475_v35 = vpop.f32.mrb[6].mxu1 }
 0x1f5   : > { %v1097_v36 = vadd.f32 %v2475_v35, %v2302_v24  ;;  %v1091_v37 = vpop.f32.mrb[7].mxu1 }
 0x1f6   : > { %v1092_v38 = vadd.f32 %v2302_v24, %v1091_v37  ;;  %v1242_v63 = vld [vmem:[#allocation2 + $0x8] sm:$0xff] }
 0x1f7   : > { %v1125_v39 = vld [vmem:[#allocation2] sm:$0xff]  ;;  %1116 = vst.msk [vmem:[#allocation2 + $0x28] sm:$0xff] %vm1110_vm2, %v1097_v36 }
 0x1f8   : > { %v1199_v40 = vadd.f32 %v1195_v12, %v1125_v39  ;;  %1115 = vst.msk [vmem:[#allocation2 + $0x20] sm:$0xff] %vm1110_vm2, %v1092_v38  ;;  %v2478_v41 = vpop.f32.mrb[8].mxu1 }
 0x1f9   : > { %v1107_v42 = vadd.f32 %v2478_v41, %v2302_v24  ;;  %v1101_v43 = vpop.f32.mrb[9].mxu1 }
 0x1fa   : > { %v2311_v44 = vmul.f32 -1.442695, %v1199_v40  ;;  %v1102_v45 = vadd.f32 %v2302_v24, %v1101_v43 }
 0x1fb   : > { %1118 = vst.msk [vmem:[#allocation2 + $0x38] sm:$0xff] %vm1110_vm2, %v1107_v42  ;;  %v1353_v23 = vld [vmem:[#allocation2 + $0x10] sm:$0xff] }
 0x1fc   : > { %2727 = vpow2.f32 %v2311_v44  ;;  %1117 = vst.msk [vmem:[#allocation2 + $0x30] sm:$0xff] %vm1110_vm2, %v1102_v45  ;;  %v1464_v45 = vld [vmem:[#allocation2 + $0x18] sm:$0xff] }
 0x206   : > { %v2728_v46 = vpop.eup %2727 }
 0x207   : > { %v1203_v47 = vadd.f32 1.0, %v2728_v46 }
 0x209   : > { %2729 = vrcp.f32 %v1203_v47 }
 0x213   : > { %v2730_v49 = vpop.eup %2729 }
 0x214   : > { %v1219_v50 = vmul.f32 %v2730_v49, %v1217_v48  ;;  %v1226_v54 = vsub.f32 1.0, %v2730_v49  ;;  %v1232_v56 = vmul.f32 0.0, %v2730_v49 }
 0x216   : > { %1221 = vrot.lane.b32.xlu1 %v1219_v50, %s2804_s27 }
 0x288   : > { %v1222_v51 = vpop.permute.xlu1 %1221 }
 0x289   : > { %v1224_v52 = vadd.f32 %v1222_v51, %v1125_v39 }
 0x28b   : > { %2731 = vtanh.f32 %v1224_v52 }
 0x295   : > { %v2732_v53 = vpop.eup %2731 }
 0x296   : > { %1228 = vrot.lane.b32.xlu1 %v2732_v53, %s2805_s22 }
 0x308   : > { %v1229_v55 = vpop.permute.xlu1 %1228 }
 0x309   : > { %v1231_v57 = vmul.f32 %v1229_v55, %v1226_v54 }
 0x30b   : > { %v3084_v58 = vadd.f32 %v1232_v56, %v1231_v57 }
 0x30d   : > { %1244 = vrot.lane.b32.xlu0 %v3084_v58, %s2805_s22 }
 0x37f   : > { %v1245_v59 = vpop.permute.xlu0 %1244 }
 0x380   : > { %2499 = vmatmul.mubr.msk.f32.vlgmr.msra.gmra.mrb[10].mxu1 %vm655_vm1, %v1245_v59 }
 0x381   : > { %2637 = vmatpush3.bf16.msra.mxu1 %v2983_v27  ;;  %2520 = vmatprep.mubr.msk.f32.mxu1 %vm2802_vm0, %v2803_v14 }
 0x382   : > { %2638 = vmatprep.subr.bf16.mxu1 %v2801_v11 }
 0x385   : > { %2640 = vmatpush3.bf16.msra.mxu1 %v2995_v32 }
 0x386   : > { %2647 = vmatprep.subr.bf16.mxu1 %v2801_v11 }
 0x453   : > { %v1314_v60 = vpop.f32.mrb[10].mxu1 }
 0x454   : > { %v1325_v61 = vadd.f32 %v1314_v60, %v3051_v9  ;;  %v2500_v62 = vpop.f32.mrb[11].mxu1  ;;  %v1318_v0 = vadd.f32 %v1314_v60, %v1242_v63 }
 0x456   : > { %1327 = vrot.lane.b32.xlu1 %v1325_v61, %s2804_s27  ;;  %v2314_v1 = vmul.f32 -1.442695, %v1318_v0 }
 0x458   : > { %2733 = vpow2.f32 %v2314_v1 }
 0x462   : > { %v2734_v2 = vpop.eup %2733 }
 0x463   : > { %v1322_v3 = vadd.f32 1.0, %v2734_v2  ;;  %v1575_v2 = vld [vmem:[#allocation2 + $0x20] sm:$0xff] }
 0x465   : > { %2735 = vrcp.f32 %v1322_v3 }
 0x46f   : > { %v2736_v4 = vpop.eup %2735 }
 0x470   : > { %v1337_v12 = vsub.f32 1.0, %v2736_v4  ;;  %v1343_v15 = vmul.f32 %v2736_v4, %v3084_v58 }
 0x4c8   : > { %v1328_v5 = vpop.permute.xlu1 %1327 }
 0x4c9   : > { %v1330_v6 = vmul.f32 %v2736_v4, %v1328_v5 }
 0x4cb   : > { %1332 = vrot.lane.b32.xlu0 %v1330_v6, %s2804_s27 }
 0x53d   : > { %v1333_v7 = vpop.permute.xlu0 %1332 }
 0x53e   : > { %v1335_v8 = vadd.f32 %v1333_v7, %v1242_v63 }
 0x540   : > { %2737 = vtanh.f32 %v1335_v8 }
 0x54a   : > { %v2738_v10 = vpop.eup %2737 }
 0x54b   : > { %1339 = vrot.lane.b32.xlu1 %v2738_v10, %s2805_s22 }
 0x5bd   : > { %v1340_v13 = vpop.permute.xlu1 %1339 }
 0x5be   : > { %v1342_v16 = vmul.f32 %v1340_v13, %v1337_v12 }
 0x5c0   : > { %v3100_v17 = vadd.f32 %v1343_v15, %v1342_v16 }
 0x5c2   : > { %1355 = vrot.lane.b32.xlu0 %v3100_v17, %s2805_s22 }
 0x634   : > { %v1356_v18 = vpop.permute.xlu0 %1355 }
 0x635   : > { %2510 = vmatmul.mubr.msk.f32.vlgmr.msra.gmra.mrb[12].mxu0 %vm655_vm1, %v1356_v18 }
 0x636   : > { %2643 = vmatpush3.bf16.msra.mxu0 %v2983_v27  ;;  %2531 = vmatprep.mubr.msk.f32.mxu0 %vm2802_vm0, %v2803_v14 }
 0x637   : > { %2644 = vmatprep.subr.bf16.mxu0 %v2801_v11 }
 0x63a   : > { %2646 = vmatpush3.bf16.msra.mxu0 %v2995_v32 }
 0x63b   : > { %2653 = vmatprep.subr.bf16.mxu0 %v2801_v11 }
 0x708   : > { %v1425_v19 = vpop.f32.mrb[12].mxu0 }
 0x709   : > { %v1436_v20 = vadd.f32 %v1425_v19, %v3051_v9  ;;  %v2511_v21 = vpop.f32.mrb[13].mxu0  ;;  %v1429_v24 = vadd.f32 %v1425_v19, %v1353_v23 }
 0x70b   : > { %1438 = vrot.lane.b32.xlu1 %v1436_v20, %s2804_s27  ;;  %v2316_v25 = vmul.f32 -1.442695, %v1429_v24 }
 0x70d   : > { %2739 = vpow2.f32 %v2316_v25 }
 0x717   : > { %v2740_v26 = vpop.eup %2739 }
 0x718   : > { %v1433_v28 = vadd.f32 1.0, %v2740_v26 }
 0x71a   : > { %2741 = vrcp.f32 %v1433_v28  ;;  %v1686_v28 = vld [vmem:[#allocation2 + $0x28] sm:$0xff] }
 0x724   : > { %v2742_v29 = vpop.eup %2741 }
 0x725   : > { %v1448_v36 = vsub.f32 1.0, %v2742_v29  ;;  %v1454_v38 = vmul.f32 %v2742_v29, %v3100_v17 }
 0x77d   : > { %v1439_v30 = vpop.permute.xlu1 %1438 }
 0x77e   : > { %v1441_v31 = vmul.f32 %v2742_v29, %v1439_v30 }
 0x780   : > { %1443 = vrot.lane.b32.xlu0 %v1441_v31, %s2804_s27 }
 0x7f2   : > { %v1444_v33 = vpop.permute.xlu0 %1443 }
 0x7f3   : > { %v1446_v34 = vadd.f32 %v1444_v33, %v1353_v23 }
 0x7f5   : > { %2743 = vtanh.f32 %v1446_v34 }
 0x7ff   : > { %v2744_v35 = vpop.eup %2743 }
 0x800   : > { %1450 = vrot.lane.b32.xlu1 %v2744_v35, %s2805_s22 }
 0x872   : > { %v1451_v37 = vpop.permute.xlu1 %1450 }
 0x873   : > { %v1453_v39 = vmul.f32 %v1451_v37, %v1448_v36 }
 0x875   : > { %v3116_v40 = vadd.f32 %v1454_v38, %v1453_v39 }
 0x877   : > { %1466 = vrot.lane.b32.xlu0 %v3116_v40, %s2805_s22 }
 0x8e9   : > { %v1467_v41 = vpop.permute.xlu0 %1466 }
 0x8ea   : > { %2521 = vmatmul.mubr.msk.f32.vlgmr.msra.gmra.mrb[12].mxu1 %vm655_vm1, %v1467_v41 }
 0x8eb   : > { %2649 = vmatpush3.bf16.msra.mxu1 %v2983_v27  ;;  %2542 = vmatprep.mubr.msk.f32.mxu1 %vm2802_vm0, %v2803_v14 }
 0x8ec   : > { %2650 = vmatprep.subr.bf16.mxu1 %v2801_v11 }
 0x8ef   : > { %2652 = vmatpush3.bf16.msra.mxu1 %v2995_v32 }
 0x8f0   : > { %2659 = vmatprep.subr.bf16.mxu1 %v2801_v11 }
 0x9bd   : > { %v1536_v42 = vpop.f32.mrb[12].mxu1 }
 0x9be   : > { %v1547_v43 = vadd.f32 %v1536_v42, %v3051_v9  ;;  %v2522_v44 = vpop.f32.mrb[13].mxu1  ;;  %v1540_v46 = vadd.f32 %v1536_v42, %v1464_v45 }
 0x9c0   : > { %1549 = vrot.lane.b32.xlu1 %v1547_v43, %s2804_s27  ;;  %v2318_v47 = vmul.f32 -1.442695, %v1540_v46 }
 0x9c2   : > { %2745 = vpow2.f32 %v2318_v47 }
 0x9cc   : > { %v2746_v48 = vpop.eup %2745 }
 0x9cd   : > { %v1544_v49 = vadd.f32 1.0, %v2746_v48  ;;  %v1797_v48 = vld [vmem:[#allocation2 + $0x30] sm:$0xff] }
 0x9cf   : > { %2747 = vrcp.f32 %v1544_v49 }
 0x9d9   : > { %v2748_v50 = vpop.eup %2747 }
 0x9da   : > { %v1559_v56 = vsub.f32 1.0, %v2748_v50  ;;  %v1565_v59 = vmul.f32 %v2748_v50, %v3116_v40 }
 0xa32   : > { %v1550_v51 = vpop.permute.xlu1 %1549 }
 0xa33   : > { %v1552_v52 = vmul.f32 %v2748_v50, %v1550_v51 }
 0xa35   : > { %1554 = vrot.lane.b32.xlu0 %v1552_v52, %s2804_s27 }
 0xaa7   : > { %v1555_v53 = vpop.permute.xlu0 %1554 }
 0xaa8   : > { %v1557_v54 = vadd.f32 %v1555_v53, %v1464_v45 }
 0xaaa   : > { %2749 = vtanh.f32 %v1557_v54 }
 0xab4   : > { %v2750_v55 = vpop.eup %2749 }
 0xab5   : > { %1561 = vrot.lane.b32.xlu1 %v2750_v55, %s2805_s22 }
 0xb27   : > { %v1562_v57 = vpop.permute.xlu1 %1561 }
 0xb28   : > { %v1564_v60 = vmul.f32 %v1562_v57, %v1559_v56 }
 0xb2a   : > { %v3132_v61 = vadd.f32 %v1565_v59, %v1564_v60 }
 0xb2c   : > { %1577 = vrot.lane.b32.xlu0 %v3132_v61, %s2805_s22 }
 0xb9e   : > { %v1578_v62 = vpop.permute.xlu0 %1577 }
 0xb9f   : > { %2532 = vmatmul.mubr.msk.f32.vlgmr.msra.gmra.mrb[14].mxu0 %vm655_vm1, %v1578_v62 }
 0xba0   : > { %2655 = vmatpush3.bf16.msra.mxu0 %v2983_v27  ;;  %2553 = vmatprep.mubr.msk.f32.mxu0 %vm2802_vm0, %v2803_v14 }
 0xba1   : > { %2656 = vmatprep.subr.bf16.mxu0 %v2801_v11 }
 0xba4   : > { %2658 = vmatpush3.bf16.msra.mxu0 %v2995_v32 }
 0xba5   : > { %2665 = vmatprep.subr.bf16.mxu0 %v2801_v11 }
 0xc72   : > { %v1647_v63 = vpop.f32.mrb[14].mxu0 }
 0xc73   : > { %v1658_v0 = vadd.f32 %v1647_v63, %v3051_v9  ;;  %v2533_v1 = vpop.f32.mrb[15].mxu0  ;;  %v1651_v3 = vadd.f32 %v1647_v63, %v1575_v2 }
 0xc75   : > { %1660 = vrot.lane.b32.xlu1 %v1658_v0, %s2804_s27  ;;  %v2320_v4 = vmul.f32 -1.442695, %v1651_v3  ;;  %v2806_v3 = vmov 0  }
 0xc76   : > { %2707 = vset.pattern.permute.xlu1 %v2806_v3  ;;  %2708 = vset.pattern.permute.xlu0 %v2806_v3 }
 0xc77   : > { %2751 = vpow2.f32 %v2320_v4  ;;  %v1124_v4 = vld [vmem:[%s638_s20] sm:$0xff] }
 0xc78   : > { %vm1234_vm3 = vcmp.eq.s32.totalorder %v1124_v4, 0  ;;  %vm1456_vm4 = vcmp.eq.s32.totalorder %v1124_v4, 2  ;;  %vm1567_vm5 = vcmp.eq.s32.totalorder %v1124_v4, 3  ;;  %vm1789_vm6 = vcmp.eq.s32.totalorder %v1124_v4, 5 }
 0xc79   : > { %vm2011_vm7 = vcmp.eq.s32.totalorder %v1124_v4, 7  ;;  %vm1345_vm8 = vcmp.eq.s32.totalorder %v1124_v4, 1  ;;  %vm1678_vm9 = vcmp.eq.s32.totalorder %v1124_v4, 4  ;;  %vm1900_vm10 = vcmp.eq.s32.totalorder %v1124_v4, 6  ;;  %v2291_v4 = vld [vmem:[%s3261_s8] ss:$0 sm:$0xff] }
 0xc81   : > { %v2752_v5 = vpop.eup %2751 }
 0xc82   : > { %v1655_v6 = vadd.f32 1.0, %v2752_v5 }
 0xc84   : > { %2753 = vrcp.f32 %v1655_v6 }
 0xc8e   : > { %v2754_v7 = vpop.eup %2753 }
 0xc8f   : > { %v1670_v16 = vsub.f32 1.0, %v2754_v7  ;;  %v1676_v19 = vmul.f32 %v2754_v7, %v3132_v61 }
 0xce7   : > { %v1661_v8 = vpop.permute.xlu1 %1660 }
 0xce8   : > { %v1663_v10 = vmul.f32 %v2754_v7, %v1661_v8  ;;  %v1235_v8 = vsel %vm1234_vm3, 1, %v2806_v3 }
 0xcea   : > { %1665 = vrot.lane.b32.xlu0 %v1663_v10, %s2804_s27  ;;  %v1457_v10 = vsel %vm1456_vm4, 1, %v2806_v3  ;;  %vm2193_vm4 = vcmask 7168  }
 0xd5c   : > { %v1666_v12 = vpop.permute.xlu0 %1665 }
 0xd5d   : > { %v1668_v13 = vadd.f32 %v1666_v12, %v1575_v2  ;;  %v1790_v12 = vsel %vm1789_vm6, 1, %v2806_v3 }
 0xd5f   : > { %2755 = vtanh.f32 %v1668_v13  ;;  %v2012_v13 = vsel %vm2011_vm7, 1, %v2806_v3 }
 0xd69   : > { %v2756_v15 = vpop.eup %2755 }
 0xd6a   : > { %1672 = vrot.lane.b32.xlu1 %v2756_v15, %s2805_s22  ;;  %v1908_v15 = vld [vmem:[#allocation2 + $0x38] sm:$0xff] }
 0xddc   : > { %v1673_v18 = vpop.permute.xlu1 %1672 }
 0xddd   : > { %v1675_v20 = vmul.f32 %v1673_v18, %v1670_v16 }
 0xddf   : > { %v3148_v21 = vadd.f32 %v1676_v19, %v1675_v20 }
 0xde1   : > { %1688 = vrot.lane.b32.xlu0 %v3148_v21, %s2805_s22 }
 0xe53   : > { %v1689_v23 = vpop.permute.xlu0 %1688 }
 0xe54   : > { %2543 = vmatmul.mubr.msk.f32.vlgmr.msra.gmra.mrb[14].mxu1 %vm655_vm1, %v1689_v23 }
 0xe55   : > { %2661 = vmatpush3.bf16.msra.mxu1 %v2983_v27  ;;  %2564 = vmatprep.mubr.msk.f32.mxu1 %vm2802_vm0, %v2803_v14 }
 0xe56   : > { %2662 = vmatprep.subr.bf16.mxu1 %v2801_v11 }
 0xe59   : > { %2664 = vmatpush3.bf16.msra.mxu1 %v2995_v32 }
 0xe5a   : > { %2671 = vmatprep.subr.bf16.mxu1 %v2801_v11 }
 0xf27   : > { %v1758_v24 = vpop.f32.mrb[14].mxu1 }
 0xf28   : > { %v1769_v25 = vadd.f32 %v1758_v24, %v3051_v9  ;;  %v2544_v26 = vpop.f32.mrb[15].mxu1  ;;  %v1762_v29 = vadd.f32 %v1758_v24, %v1686_v28 }
 0xf29   : > { %v1679_v26 = vsel %vm1678_vm9, 1, %v2806_v3 }
 0xf2a   : > { %1771 = vrot.lane.b32.xlu1 %v1769_v25, %s2804_s27  ;;  %v2322_v30 = vmul.f32 -1.442695, %v1762_v29  ;;  %v1346_v25 = vsel %vm1345_vm8, 1, %v2806_v3 }
 0xf2c   : > { %2757 = vpow2.f32 %v2322_v30 }
 0xf36   : > { %v2758_v27 = vpop.eup %2757 }
 0xf37   : > { %v1766_v31 = vadd.f32 1.0, %v2758_v27  ;;  %v2018_v27 = vld [vmem:[%s3266_s13] sm:$0xff] }
 0xf39   : > { %2759 = vrcp.f32 %v1766_v31  ;;  %v2019_v31 = vld [vmem:[%s3266_s13 + $0x8] sm:$0xff] }
 0xf43   : > { %v2760_v33 = vpop.eup %2759 }
 0xf44   : > { %v1781_v38 = vsub.f32 1.0, %v2760_v33  ;;  %v1787_v41 = vmul.f32 %v2760_v33, %v3148_v21 }
 0xf9c   : > { %v1772_v34 = vpop.permute.xlu1 %1771 }
 0xf9d   : > { %v1774_v35 = vmul.f32 %v2760_v33, %v1772_v34  ;;  %v2020_v33 = vld [vmem:[%s3266_s13 + $0x10] sm:$0xff]  ;;  %v2666_v34 = vpack.c.bf16 %v2019_v31, %v2018_v27 }
 0xf9f   : > { %1776 = vrot.lane.b32.xlu0 %v1774_v35, %s2804_s27  ;;  %v2021_v35 = vld [vmem:[%s3266_s13 + $0x18] sm:$0xff] }
0x1011   : > { %v1777_v32 = vpop.permute.xlu0 %1776 }
0x1012   : > { %v1779_v36 = vadd.f32 %v1777_v32, %v1686_v28  ;;  %v1901_v28 = vsel %vm1900_vm10, 1, %v2806_v3  ;;  %v2669_v32 = vpack.c.bf16 %v2021_v35, %v2020_v33 }
0x1014   : > { %2761 = vtanh.f32 %v1779_v36 }
0x101e   : > { %v2762_v37 = vpop.eup %2761 }
0x101f   : > { %1783 = vrot.lane.b32.xlu1 %v2762_v37, %s2805_s22 }
0x1091   : > { %v1784_v39 = vpop.permute.xlu1 %1783 }
0x1092   : > { %v1786_v42 = vmul.f32 %v1784_v39, %v1781_v38 }
0x1094   : > { %v3164_v43 = vadd.f32 %v1787_v41, %v1786_v42 }
0x1096   : > { %1799 = vrot.lane.b32.xlu0 %v3164_v43, %s2805_s22 }
0x1108   : > { %v1800_v44 = vpop.permute.xlu0 %1799 }
0x1109   : > { %2554 = vmatmul.mubr.msk.f32.vlgmr.msra.gmra.mrb[16].mxu0 %vm655_vm1, %v1800_v44 }
0x110a   : > { %2575 = vmatprep.mubr.msk.f32.mxu0 %vm2802_vm0, %v2803_v14  ;;  %2667 = vmatpush3.bf16.msra.mxu0 %v2666_v34 }
0x110b   : > { %2668 = vmatprep.subr.bf16.mxu0 %v2801_v11 }
0x110e   : > { %2670 = vmatpush3.bf16.msra.mxu0 %v2669_v32 }
0x11dc   : > { %v1869_v45 = vpop.f32.mrb[16].mxu0 }
0x11dd   : > { %v1880_v46 = vadd.f32 %v1869_v45, %v3051_v9  ;;  %v2555_v47 = vpop.f32.mrb[17].mxu0  ;;  %v1873_v49 = vadd.f32 %v1869_v45, %v1797_v48 }
0x11df   : > { %1882 = vrot.lane.b32.xlu1 %v1880_v46, %s2804_s27  ;;  %v2324_v50 = vmul.f32 -1.442695, %v1873_v49 }
0x11e1   : > { %2763 = vpow2.f32 %v2324_v50 }
0x11eb   : > { %v2764_v51 = vpop.eup %2763 }
0x11ec   : > { %v1877_v52 = vadd.f32 1.0, %v2764_v51 }
0x11ee   : > { %2765 = vrcp.f32 %v1877_v52 }
0x11f8   : > { %v2766_v53 = vpop.eup %2765 }
0x11f9   : > { %v1892_v60 = vsub.f32 1.0, %v2766_v53  ;;  %v1898_v63 = vmul.f32 %v2766_v53, %v3164_v43 }
0x1251   : > { %v1883_v54 = vpop.permute.xlu1 %1882 }
0x1252   : > { %v1885_v55 = vmul.f32 %v2766_v53, %v1883_v54 }
0x1254   : > { %1887 = vrot.lane.b32.xlu0 %v1885_v55, %s2804_s27 }
0x12c6   : > { %v1888_v56 = vpop.permute.xlu0 %1887 }
0x12c7   : > { %v1890_v57 = vadd.f32 %v1888_v56, %v1797_v48 }
0x12c9   : > { %2767 = vtanh.f32 %v1890_v57  ;;  %v2106_v57 = vld [vmem:[%s3268_s15 + $0x8] sm:$0xff] }
0x12d3   : > { %v2768_v59 = vpop.eup %2767 }
0x12d4   : > { %1894 = vrot.lane.b32.xlu1 %v2768_v59, %s2805_s22 }
0x1346   : > { %v1895_v62 = vpop.permute.xlu1 %1894 }
0x1347   : > { %v1897_v0 = vmul.f32 %v1895_v62, %v1892_v60  ;;  %v2108_v60 = vld [vmem:[%s3268_s15 + $0x18] sm:$0xff] }
0x1349   : > { %v3176_v1 = vadd.f32 %v1898_v63, %v1897_v0  ;;  %v2327_v63 = vld [vmem:[%s3267_s14] ss:$0 sm:$0xff] }
0x134b   : > { %1910 = vrot.lane.b32.xlu0 %v3176_v1, %s2805_s22 }
0x13bd   : > { %v1911_v2 = vpop.permute.xlu0 %1910 }
0x13be   : > { %2565 = vmatmul.mubr.msk.f32.vlgmr.msra.gmra.mrb[16].mxu1 %vm655_vm1, %v1911_v2 }
0x13bf   : > { %2586 = vmatprep.mubr.msk.f32.mxu1 %vm2802_vm0, %v2803_v14  ;;  %v1568_v14 = vsel %vm1567_vm5, 1, %v2806_v3 }
0x1491   : > { %v1980_v5 = vpop.f32.mrb[16].mxu1 }
0x1492   : > { %v1991_v6 = vadd.f32 %v1980_v5, %v3051_v9  ;;  %v2566_v7 = vpop.f32.mrb[17].mxu1  ;;  %v1984_v9 = vadd.f32 %v1980_v5, %v1908_v15 }
0x1494   : > { %1993 = vrot.lane.b32.xlu1 %v1991_v6, %s2804_s27  ;;  %v2326_v16 = vmul.f32 -1.442695, %v1984_v9  ;;  %v811_v6 = vadd.f32 %v2291_v4, %v3069_v22 }
0x1496   : > { %2769 = vpow2.f32 %v2326_v16 }
0x1498   : > { %1237 = vperm.xlu1 %2707, %v1235_v8  }
0x149c   : > { %1459 = vperm.xlu1 %2707, %v1457_v10  }
0x14a0   : > { %1570 = vperm.xlu1 %2707, %v1568_v14   ;;  %v2770_v18 = vpop.eup %2769 }
0x14a1   : > { %v1988_v19 = vadd.f32 1.0, %v2770_v18 }
0x14a3   : > { %2771 = vrcp.f32 %v1988_v19 }
0x14a4   : > { %1792 = vperm.xlu1 %2707, %v1790_v12  }
0x14a8   : > { %2014 = vperm.xlu1 %2707, %v2012_v13  }
0x14ad   : > { %v2772_v20 = vpop.eup %2771 }
0x14ae   : > { %v2003_v50 = vsub.f32 1.0, %v2772_v20  ;;  %v2009_v53 = vmul.f32 %v2772_v20, %v3176_v1 }
0x1506   : > { %v1994_v23 = vpop.permute.xlu1 %1993 }
0x1507   : > { %v1996_v24 = vmul.f32 %v2772_v20, %v1994_v23 }
0x1509   : > { %1998 = vrot.lane.b32.xlu0 %v1996_v24, %s2804_s27 }
0x150d   : > { %1348 = vperm.xlu0 %2708, %v1346_v25  }
0x1511   : > { %1681 = vperm.xlu0 %2708, %v1679_v26  }
0x1515   : > { %1903 = vperm.xlu0 %2708, %v1901_v28  }
0x1517   : > { %v1238_v37 = vpop.permute.xlu1 %1237 }
0x1518   : > { %vm1239_vm11 = vcmp.eq.s32.totalorder %v1238_v37, 1 }
0x1519   : > { %v1240_v41 = vsel %vm1239_vm11, %v3084_v58, 0.0 }
0x151b   : > { %v1460_v39 = vpop.permute.xlu1 %1459 }
0x151c   : > { %vm1461_vm13 = vcmp.eq.s32.totalorder %v1460_v39, 1 }
0x151f   : > { %v1571_v45 = vpop.permute.xlu1 %1570 }
0x1520   : > { %vm1572_vm14 = vcmp.eq.s32.totalorder %v1571_v45, 1 }
0x1523   : > { %v1793_v49 = vpop.permute.xlu1 %1792 }
0x1524   : > { %vm1794_vm0 = vcmp.eq.s32.totalorder %v1793_v49, 1 }
0x1527   : > { %v2015_v58 = vpop.permute.xlu1 %2014 }
0x1528   : > { %vm2016_vm3 = vcmp.eq.s32.totalorder %v2015_v58, 1 }
0x157b   : > { %v1999_v29 = vpop.permute.xlu0 %1998 }
0x157c   : > { %v2001_v30 = vadd.f32 %v1999_v29, %v1908_v15 }
0x157e   : > { %2773 = vtanh.f32 %v2001_v30 }
0x1588   : > { %v2774_v36 = vpop.eup %2773 }
0x1589   : > { %2005 = vrot.lane.b32.xlu0 %v2774_v36, %s2805_s22 }
0x158c   : > { %v1349_v38 = vpop.permute.xlu0 %1348 }
0x158d   : > { %vm1350_vm12 = vcmp.eq.s32.totalorder %v1349_v38, 1 }
0x158e   : > { %v1351_v44 = vsel %vm1350_vm12, %v3100_v17, %v1240_v41 }
0x158f   : > { %v1462_v46 = vsel %vm1461_vm13, %v3116_v40, %v1351_v44 }
0x1590   : > { %v1682_v42 = vpop.permute.xlu0 %1681  ;;  %v1573_v48 = vsel %vm1572_vm14, %v3132_v61, %v1462_v46 }
0x1591   : > { %vm1683_vm15 = vcmp.eq.s32.totalorder %v1682_v42, 1 }
0x1592   : > { %v1684_v51 = vsel %vm1683_vm15, %v3148_v21, %v1573_v48  ;;  %v2105_v21 = vld [vmem:[%s3268_s15] sm:$0xff] }
0x1593   : > { %v1795_v17 = vsel %vm1794_vm0, %v3164_v43, %v1684_v51  ;;  %v2107_v43 = vld [vmem:[%s3268_s15 + $0x10] sm:$0xff]  ;;  %v2672_v59 = vpack.c.bf16 %v2106_v57, %v2105_v21 }
0x1594   : > { %v1904_v47 = vpop.permute.xlu0 %1903  ;;  %v2675_v62 = vpack.c.bf16 %v2108_v60, %v2107_v43 }
0x1595   : > { %vm1905_vm2 = vcmp.eq.s32.totalorder %v1904_v47, 1  ;;  %2673 = vmatpush3.bf16.msra.mxu1 %v2672_v59 }
0x1596   : > { %v1906_v40 = vsel %vm1905_vm2, %v3176_v1, %v1795_v17  ;;  %2674 = vmatprep.subr.bf16.mxu1 %v2801_v11  ;;  %v2329_v11 = vld [vmem:[%s3269_s16] ss:$0 sm:$0xff] }
0x1599   : > { %2676 = vmatpush3.bf16.msra.mxu1 %v2675_v62 }
0x15fb   : > { %v2006_v52 = vpop.permute.xlu0 %2005 }
0x15fc   : > { %v2008_v54 = vmul.f32 %v2006_v52, %v2003_v50 }
0x15fe   : > { %v2010_v55 = vadd.f32 %v2009_v53, %v2008_v54 }
0x1600   : > { %v2017_v56 = vsel %vm2016_vm3, %v2010_v55, %v1906_v40 }
0x1601   : > { %2030 = vrot.lane.b32.xlu1 %v2017_v56, %s2805_s22 }
0x1673   : > { %v2031_v61 = vpop.permute.xlu1 %2030 }
0x1674   : > { %2576 = vmatmul.mubr.msk.f32.vlgmr.msra.gmra.mrb[18].mxu0 %vm655_vm1, %v2031_v61 }
0x1747   : > { %v2100_v0 = vpop.f32.mrb[18].mxu0 }
0x1748   : > { %v2101_v1 = vadd.f32 %v2327_v63, %v2100_v0  ;;  %v2577_v2 = vpop.f32.mrb[19].mxu0 }
0x174a   : > { %2775 = vtanh.f32 %v2101_v1 }
0x1754   : > { %v2776_v3 = vpop.eup %2775 }
0x1755   : > { %2587 = vmatmul.mubr.msk.f32.vlgmr.msra.gmra.mrb[18].mxu1 %vm655_vm1, %v2776_v3 }
0x1828   : > { %v2185_v5 = vpop.f32.mrb[18].mxu1 }
0x1829   : > { %v2186_v7 = vadd.f32 %v2329_v11, %v2185_v5  ;;  %v2588_v8 = vpop.f32.mrb[19].mxu1 }
0x182b   : > { %v2189_v10 = vmul.f32 %v2186_v7, %v811_v6 }
0x182d   : > { %v2190_v14 = vsel %vm655_vm1, %v2189_v10, 0.0 }
0x182e   : > { %2191 = vadd.xlane.f32.xlu0 %v2190_v14 }
0x18bb   : > { %v2192_v12 = vpop.xlane.xlu0 %2191 }
0x18bc   : > { %2194 = vst.msk [vmem:[%s642_s19] sm:$0xff] %vm2193_vm4, %v2192_v12 }
0x18bd PF: > { %p24_p9 = scmp.ge.s32.totalorder %s2914_s28, 4   ;;  %s3275_s24 = smov %s2795_s25 }
0x18be   : > { %s3276_s25 = smov %s2923_s30  ;;  %s3277_s26 = smov %s2914_s28 }
0x18bf   :  { %26 = sbr.rel (!%p24_p9) target bundleno = 5 (0x5), region = 174 }

</bundles_post_ra>
